<compile_context>
chip_gen: v6e
topology: v6e:2x2x1
jax: 0.10.0
libtpu: 0.0.40
codegen_flags: <defaults>
</compile_context>

<pallas_src>
import jax
import jax.numpy as jnp
import numpy as np
from jax.experimental import pallas as pl
from jax.experimental.pallas import tpu as pltpu

_LANE = 128      # final output channel dim padded to this for lane-dense stores
_LN_EPS = 1e-5


# ----------------------------------------------------------------------------
# small in-kernel helpers
# ----------------------------------------------------------------------------
def _erf(x):
    # Abramowitz & Stegun 7.1.26 (max abs err ~1.5e-7); mul/add/exp only.
    a1, a2, a3, a4, a5 = (0.254829592, -0.284496736, 1.421413741,
                          -1.453152027, 1.061405429)
    p = 0.3275911
    sign = jnp.where(x < 0.0, -1.0, 1.0)
    ax = jnp.abs(x)
    t = 1.0 / (1.0 + p * ax)
    poly = ((((a5 * t + a4) * t + a3) * t + a2) * t + a1) * t
    return sign * (1.0 - poly * jnp.exp(-ax * ax))


def _gelu(x):
    # exact (erf-based) GELU, matching torch.nn.GELU()
    return 0.5 * x * (1.0 + _erf(x * 0.7071067811865476))


def _layernorm(x, g, b):
    m = jnp.mean(x, axis=-1, keepdims=True)
    xc = x - m
    var = jnp.mean(xc * xc, axis=-1, keepdims=True)
    return xc * jax.lax.rsqrt(var + _LN_EPS) * g + b


def _dot(a, b):
    return jax.lax.dot_general(a, b, (((1,), (0,)), ((), ())),
                               preferred_element_type=jnp.float32)


def _dot_rhs_t(a, b):
    # contract last dims of both operands (a @ b.T without materializing b.T)
    return jax.lax.dot_general(a, b, (((1,), (1,)), ((), ())),
                               preferred_element_type=jnp.float32)


# ----------------------------------------------------------------------------
# Fused Generator kernel: one grid step == (one batch element, one layer)
# ----------------------------------------------------------------------------
def _generator_kernel(z_ref, lab_ref, w_le_ref, b_le_ref,
                      rz_ref, rc_ref, bdiag_ref, w1_ref, b1_ref,
                      hm_ref, seg_ref,
                      ln1g_ref, ln1b_ref, wq_ref, bq_ref, wk_ref, bk_ref,
                      wv_ref, bv_ref, wo_ref, bo_ref,
                      ln2g_ref, ln2b_ref, wf1_ref, bf1_ref, wf2_ref, bf2_ref,
                      wcv_ref, bcv_ref,
                      o_ref, x_ref):
    d = pl.program_id(1)
    n_layers = pl.num_programs(1)
    E = wo_ref.shape[-1]
    N = b1_ref.shape[0]
    HN = hm_ref.shape[0]
    H = HN // N
    inv_scale = 1.0 / (float(E) ** 0.5)   # PyTorch scales by sqrt(emb_size)

    # ---- label embedding + first linear, only on the first layer step -----
    @pl.when(d == 0)
    def _first_linear():
        lab = lab_ref[0]                                         # (1, 1)
        c = lab * w_le_ref[...] + b_le_ref[...]                  # (1, L)
        zrow = z_ref[0]                                          # (1, Lz)
        # zc replicated N times along lanes via 0/1 replication matmuls
        # (also fuses the z / c halves of the first linear).
        zc_rep = _dot(zrow, rz_ref[...]) + _dot(c, rc_ref[...])  # (1, N*K)
        lmat = bdiag_ref[...] * zc_rep                           # (N, N*K)
        # single block-diagonal matmul emits x directly in (N, E) layout
        x_ref[...] = _dot(lmat, w1_ref[...]) + b1_ref[...]       # (N, E)

    x = x_ref[...]                                               # (N, E)
    hm = hm_ref[...]                                             # (H*N, E)

    # ---- multi-head self-attention sub-block (heads batched) --------------
    xn = _layernorm(x, ln1g_ref[0], ln1b_ref[0])
    q = _dot(xn, wq_ref[0]) + bq_ref[0]
    k = _dot(xn, wk_ref[0]) + bk_ref[0]
    v = _dot(xn, wv_ref[0]) + bv_ref[0]

    # head h's K/V live in row block h, masked to head h's embedding lanes;
    # q @ kbig^T then gives ALL heads' energies in one matmul.
    kbig = jnp.concatenate([k] * H, axis=0) * hm                 # (H*N, E)
    vbig = jnp.concatenate([v] * H, axis=0) * hm                 # (H*N, E)

    energy = _dot_rhs_t(q, kbig) * inv_scale                     # (N, H*N)
    # per-row constant subtraction is softmax-invariant within every segment
    energy = energy - jnp.max(energy, axis=-1, keepdims=True)
    p = jnp.exp(energy)
    # per-head segment sums broadcast back to every column of the segment
    denom = _dot(p, seg_ref[...])                                # (N, H*N)
    att = p * pl.reciprocal(denom, approx=True)
    # att @ vbig sums per-head outputs == "concat heads" (disjoint lanes)
    attn_out = _dot(att, vbig)                                   # (N, E)
    x = x + _dot(attn_out, wo_ref[0]) + bo_ref[0]   # residual (dropout = id)

    # ---- feed-forward sub-block -------------------------------------------
    xn2 = _layernorm(x, ln2g_ref[0], ln2b_ref[0])
    h1 = _gelu(_dot(xn2, wf1_ref[0]) + bf1_ref[0])
    x = x + _dot(h1, wf2_ref[0]) + bf2_ref[0]        # residual
    x_ref[...] = x

    # ---- final 1x1 conv (linear over E), only on the last layer step ------
    @pl.when(d == n_layers - 1)
    def _final_conv():
        o_ref[0] = (_dot(x, wcv_ref[...]) + bcv_ref[...]).astype(o_ref.dtype)


# ----------------------------------------------------------------------------
# Parameter construction (deterministic, synthetic)
# ----------------------------------------------------------------------------
def init_params(key, cfg):
    E = cfg["data_embed_dim"]
    ff = 4 * E                      # forward_expansion = 4
    n_keys = 8 + cfg["depth"] * 16
    keys = iter(jax.random.split(key, n_keys))

    def w(shape):
        return jax.random.normal(next(keys), shape, jnp.float32) * 0.05

    params = {
        "w_le": w((1, cfg["label_embed_dim"])),
        "b_le": w((1, cfg["label_embed_dim"])),
        "w_l1": w((cfg["latent_dim"] + cfg["label_embed_dim"],
                   cfg["seq_len"] * E)),
        "b_l1": w((1, cfg["seq_len"] * E)),
        "blocks": [],
        "w_conv": w((E, cfg["channels"])),    # 1x1 Conv2d(E, C) == linear
        "b_conv": w((1, cfg["channels"])),
    }
    for _ in range(cfg["depth"]):
        params["blocks"].append({
            "ln1_g": jnp.ones((1, E), jnp.float32),
            "ln1_b": jnp.zeros((1, E), jnp.float32),
            "wq": w((E, E)), "bq": w((1, E)),
            "wk": w((E, E)), "bk": w((1, E)),
            "wv": w((E, E)), "bv": w((1, E)),
            "wo": w((E, E)), "bo": w((1, E)),
            "ln2_g": jnp.ones((1, E), jnp.float32),
            "ln2_b": jnp.zeros((1, E), jnp.float32),
            "wf1": w((E, ff)), "bf1": w((1, ff)),
            "wf2": w((ff, E)), "bf2": w((1, E)),
        })
    return params


_BLOCK_PARAM_ORDER = ("ln1_g", "ln1_b", "wq", "bq", "wk", "bk", "wv", "bv",
                      "wo", "bo", "ln2_g", "ln2_b", "wf1", "bf1", "wf2", "bf2")


# ----------------------------------------------------------------------------
# Generator forward: one fused pallas_call with grid=(batch, depth)
# ----------------------------------------------------------------------------
def generator_forward(z, labels, params, cfg):
    B = z.shape[0]
    N, E, C, H = (cfg["seq_len"], cfg["data_embed_dim"], cfg["channels"],
                  cfg["num_heads"])
    Lz, L = cfg["latent_dim"], cfg["label_embed_dim"]
    D = E // H
    K = Lz + L
    NK = N * K
    HN = H * N
    depth = cfg["depth"]

    # ---- weight / constant re-arrangements (tiny, host-side) --------------
    # w1big[n*K + k, e] = w_l1[k, n*E + e]
    w1big = params["w_l1"].reshape(K, N, E).transpose(1, 0, 2).reshape(NK, E)
    b1 = params["b_l1"].reshape(N, E)

    # 0/1 replication matrices: zc_rep = z @ rz + c @ rc, repeated per token
    rz = np.zeros((Lz, NK), np.float32)
    rc = np.zeros((L, NK), np.float32)
    for n in range(N):
        rz[np.arange(Lz), n * K + np.arange(Lz)] = 1.0
        rc[np.arange(L), n * K + Lz + np.arange(L)] = 1.0
    # block-diagonal 0/1 mask: bdiag[n, n'*K + k] = (n == n')
    bdiag = np.zeros((N, NK), np.float32)
    for n in range(N):
        bdiag[n, n * K:(n + 1) * K] = 1.0

    # per-head lane masks, replicated over the head row blocks
    hm_big = np.zeros((HN, E), np.float32)
    for h in range(H):
        hm_big[h * N:(h + 1) * N, h * D:(h + 1) * D] = 1.0
    # block-diagonal ones matrix for per-head softmax denominators
    seg = np.zeros((HN, HN), np.float32)
    for h in range(H):
        seg[h * N:(h + 1) * N, h * N:(h + 1) * N] = 1.0

    # lane-dense final projection: pad channel dim to 128 with zero columns
    w_conv_p = jnp.zeros((E, _LANE), jnp.float32).at[:, :C].set(params["w_conv"])
    b_conv_p = jnp.zeros((1, _LANE), jnp.float32).at[:, :C].set(params["b_conv"])

    # per-layer weight slabs (streamed along the depth grid axis)
    stacked = [jnp.stack([blk[name] for blk in params["blocks"]], axis=0)
               for name in _BLOCK_PARAM_ORDER]

    z3 = z.reshape(B, 1, Lz)
    lab3 = labels.reshape(B, 1, 1)

    const_inputs = [jnp.asarray(a) for a in
                    (params["w_le"], params["b_le"], rz, rc, bdiag, w1big, b1,
                     hm_big, seg)]

    def const_spec(arr):   # whole 2-D array, resident across the grid
        return pl.BlockSpec(arr.shape, lambda b, d: (0, 0))

    def batch_spec(arr):   # one batch element per grid step
        return pl.BlockSpec((1,) + arr.shape[1:], lambda b, d: (b, 0, 0))

    def layer_spec(arr):   # one layer's weight slab per grid step
        return pl.BlockSpec((1,) + arr.shape[1:], lambda b, d: (d, 0, 0))

    in_specs = ([batch_spec(z3), batch_spec(lab3)]
                + [const_spec(a) for a in const_inputs]
                + [layer_spec(a) for a in stacked]
                + [const_spec(w_conv_p), const_spec(b_conv_p)])

    out_spec = pl.BlockSpec((1, N, _LANE), lambda b, d: (b, 0, 0))

    out_pad = pl.pallas_call(
        _generator_kernel,
        out_shape=jax.ShapeDtypeStruct((B, N, _LANE), jnp.float32),
        grid=(B, depth),
        in_specs=in_specs,
        out_specs=out_spec,
        scratch_shapes=[pltpu.VMEM((N, E), jnp.float32)],   # running activation
        compiler_params=pltpu.CompilerParams(
            dimension_semantics=("parallel", "arbitrary"),
            vmem_limit_bytes=32 * 1024 * 1024),
    )(z3, lab3, *const_inputs, *stacked, w_conv_p, b_conv_p)

    # strip lane padding; (B, N, C) -> (B, C, 1, N) matches PyTorch NCHW output
    y = out_pad[:, :, :C]
    return jnp.transpose(y, (0, 2, 1))[:, :, None, :]


# ----------------------------------------------------------------------------
# Pure-JAX reference (mirrors the PyTorch module) for correctness checking
# ----------------------------------------------------------------------------
def reference_forward(z, labels, params, cfg):
    E, H = cfg["data_embed_dim"], cfg["num_heads"]
    D = E // H
    B, N = z.shape[0], cfg["seq_len"]

    c = labels @ params["w_le"] + params["b_le"]
    x = jnp.concatenate([z, c], axis=1)
    x = x @ params["w_l1"] + params["b_l1"]
    x = x.reshape(B, N, E)

    def ln(v, g, b):
        m = v.mean(-1, keepdims=True)
        var = ((v - m) ** 2).mean(-1, keepdims=True)
        return (v - m) / jnp.sqrt(var + _LN_EPS) * g + b

    for blk in params["blocks"]:
        xn = ln(x, blk["ln1_g"], blk["ln1_b"])
        q = (xn @ blk["wq"] + blk["bq"]).reshape(B, N, H, D).transpose(0, 2, 1, 3)
        k = (xn @ blk["wk"] + blk["bk"]).reshape(B, N, H, D).transpose(0, 2, 1, 3)
        v = (xn @ blk["wv"] + blk["bv"]).reshape(B, N, H, D).transpose(0, 2, 1, 3)
        energy = jnp.einsum("bhqd,bhkd->bhqk", q, k) / (E ** 0.5)
        att = jax.nn.softmax(energy, axis=-1)
        o = jnp.einsum("bhqk,bhkd->bhqd", att, v).transpose(0, 2, 1, 3).reshape(B, N, E)
        x = x + (o @ blk["wo"] + blk["bo"])
        xn2 = ln(x, blk["ln2_g"], blk["ln2_b"])
        h1 = jax.nn.gelu(xn2 @ blk["wf1"] + blk["bf1"], approximate=False)
        x = x + (h1 @ blk["wf2"] + blk["bf2"])

    y = x @ params["w_conv"] + params["b_conv"]
    return jnp.transpose(y, (0, 2, 1))[:, :, None, :]


# ----------------------------------------------------------------------------
if __name__ == "__main__":
    cfg = dict(
        seq_len=16,
        channels=3,
        latent_dim=32,
        data_embed_dim=20,   # divisible by num_heads=5
        label_embed_dim=8,
        depth=2,
        num_heads=5,
    )

    key = jax.random.PRNGKey(0)
    kp, kz, kl = jax.random.split(key, 3)
    params = init_params(kp, cfg)

    B = 2
    z = jax.random.normal(kz, (B, cfg["latent_dim"]), jnp.float32)
    labels = jax.random.randint(kl, (B, 1), 0, 9).astype(jnp.float32)

    out = generator_forward(z, labels, params, cfg)
    out = jax.block_until_ready(out)

    ref = reference_forward(z, labels, params, cfg)
    assert out.shape == (B, cfg["channels"], 1, cfg["seq_len"]), out.shape
    err = float(jnp.max(jnp.abs(out - ref)))
    assert err < 2e-3, err

    print("KERNEL_OK")
</pallas_src>

<mosaic_0001>
module attributes {stable_mosaic.version = 11 : i64} {
  func.func @_generator_kernel(%arg0: i32, %arg1: i32, %arg2: memref<1x1x32xf32, #tpu.memory_space<vmem>>, %arg3: memref<1x1x1xf32, #tpu.memory_space<vmem>>, %arg4: memref<1x8xf32, #tpu.memory_space<vmem>>, %arg5: memref<1x8xf32, #tpu.memory_space<vmem>>, %arg6: memref<32x640xf32, #tpu.memory_space<vmem>>, %arg7: memref<8x640xf32, #tpu.memory_space<vmem>>, %arg8: memref<16x640xf32, #tpu.memory_space<vmem>>, %arg9: memref<640x20xf32, #tpu.memory_space<vmem>>, %arg10: memref<16x20xf32, #tpu.memory_space<vmem>>, %arg11: memref<80x20xf32, #tpu.memory_space<vmem>>, %arg12: memref<80x80xf32, #tpu.memory_space<vmem>>, %arg13: memref<1x1x20xf32, #tpu.memory_space<vmem>>, %arg14: memref<1x1x20xf32, #tpu.memory_space<vmem>>, %arg15: memref<1x20x20xf32, #tpu.memory_space<vmem>>, %arg16: memref<1x1x20xf32, #tpu.memory_space<vmem>>, %arg17: memref<1x20x20xf32, #tpu.memory_space<vmem>>, %arg18: memref<1x1x20xf32, #tpu.memory_space<vmem>>, %arg19: memref<1x20x20xf32, #tpu.memory_space<vmem>>, %arg20: memref<1x1x20xf32, #tpu.memory_space<vmem>>, %arg21: memref<1x20x20xf32, #tpu.memory_space<vmem>>, %arg22: memref<1x1x20xf32, #tpu.memory_space<vmem>>, %arg23: memref<1x1x20xf32, #tpu.memory_space<vmem>>, %arg24: memref<1x1x20xf32, #tpu.memory_space<vmem>>, %arg25: memref<1x20x80xf32, #tpu.memory_space<vmem>>, %arg26: memref<1x1x80xf32, #tpu.memory_space<vmem>>, %arg27: memref<1x80x20xf32, #tpu.memory_space<vmem>>, %arg28: memref<1x1x20xf32, #tpu.memory_space<vmem>>, %arg29: memref<20x128xf32, #tpu.memory_space<vmem>>, %arg30: memref<1x128xf32, #tpu.memory_space<vmem>>, %arg31: memref<1x16x128xf32, #tpu.memory_space<vmem>>, %arg32: memref<16x20xf32, #tpu.memory_space<vmem>>) attributes {dimension_semantics = [#tpu.dimension_semantics<parallel>, #tpu.dimension_semantics<arbitrary>], iteration_bounds = array<i64: 2, 2>, scalar_prefetch = 0 : i64, scratch_operands = 1 : i64, tpu.core_type = #tpu.core_type<tc>, window_params = [{transform_indices = @transform_0, window_bounds = array<i64: 1, 1, 32>}, {transform_indices = @transform_1, window_bounds = array<i64: 1, 1, 1>}, {pipeline_mode = #tpu.pipeline_mode<synchronous>, transform_indices = @transform_2, window_bounds = array<i64: 1, 8>}, {pipeline_mode = #tpu.pipeline_mode<synchronous>, transform_indices = @transform_3, window_bounds = array<i64: 1, 8>}, {pipeline_mode = #tpu.pipeline_mode<synchronous>, transform_indices = @transform_4, window_bounds = array<i64: 32, 640>}, {pipeline_mode = #tpu.pipeline_mode<synchronous>, transform_indices = @transform_5, window_bounds = array<i64: 8, 640>}, {pipeline_mode = #tpu.pipeline_mode<synchronous>, transform_indices = @transform_6, window_bounds = array<i64: 16, 640>}, {pipeline_mode = #tpu.pipeline_mode<synchronous>, transform_indices = @transform_7, window_bounds = array<i64: 640, 20>}, {pipeline_mode = #tpu.pipeline_mode<synchronous>, transform_indices = @transform_8, window_bounds = array<i64: 16, 20>}, {pipeline_mode = #tpu.pipeline_mode<synchronous>, transform_indices = @transform_9, window_bounds = array<i64: 80, 20>}, {pipeline_mode = #tpu.pipeline_mode<synchronous>, transform_indices = @transform_10, window_bounds = array<i64: 80, 80>}, {transform_indices = @transform_11, window_bounds = array<i64: 1, 1, 20>}, {transform_indices = @transform_12, window_bounds = array<i64: 1, 1, 20>}, {transform_indices = @transform_13, window_bounds = array<i64: 1, 20, 20>}, {transform_indices = @transform_14, window_bounds = array<i64: 1, 1, 20>}, {transform_indices = @transform_15, window_bounds = array<i64: 1, 20, 20>}, {transform_indices = @transform_16, window_bounds = array<i64: 1, 1, 20>}, {transform_indices = @transform_17, window_bounds = array<i64: 1, 20, 20>}, {transform_indices = @transform_18, window_bounds = array<i64: 1, 1, 20>}, {transform_indices = @transform_19, window_bounds = array<i64: 1, 20, 20>}, {transform_indices = @transform_20, window_bounds = array<i64: 1, 1, 20>}, {transform_indices = @transform_21, window_bounds = array<i64: 1, 1, 20>}, {transform_indices = @transform_22, window_bounds = array<i64: 1, 1, 20>}, {transform_indices = @transform_23, window_bounds = array<i64: 1, 20, 80>}, {transform_indices = @transform_24, window_bounds = array<i64: 1, 1, 80>}, {transform_indices = @transform_25, window_bounds = array<i64: 1, 80, 20>}, {transform_indices = @transform_26, window_bounds = array<i64: 1, 1, 20>}, {pipeline_mode = #tpu.pipeline_mode<synchronous>, transform_indices = @transform_27, window_bounds = array<i64: 20, 128>}, {pipeline_mode = #tpu.pipeline_mode<synchronous>, transform_indices = @transform_28, window_bounds = array<i64: 1, 128>}, {transform_indices = @transform_29, window_bounds = array<i64: 1, 16, 128>}]} {
    %c0_i32 = arith.constant 0 : i32
    %0 = arith.cmpi eq, %arg1, %c0_i32 : i32
    %1 = arith.extui %0 : i1 to i32
    %c0_i32_0 = arith.constant 0 : i32
    %2 = arith.cmpi ne, %1, %c0_i32_0 : i32
    scf.if %2 {
      %c0_93 = arith.constant 0 : index
      %c0_94 = arith.constant 0 : index
      %c0_95 = arith.constant 0 : index
      %159 = vector.load %arg3[%c0_93, %c0_94, %c0_95] : memref<1x1x1xf32, #tpu.memory_space<vmem>>, vector<1x1x1xf32>
      %160 = vector.shape_cast %159 : vector<1x1x1xf32> to vector<1x1xf32>
      %c0_96 = arith.constant 0 : index
      %c0_97 = arith.constant 0 : index
      %161 = vector.load %arg4[%c0_96, %c0_97] : memref<1x8xf32, #tpu.memory_space<vmem>>, vector<1x8xf32>
      %162 = vector.broadcast %160 : vector<1x1xf32> to vector<1x8xf32>
      %163 = arith.mulf %162, %161 : vector<1x8xf32>
      %c0_98 = arith.constant 0 : index
      %c0_99 = arith.constant 0 : index
      %164 = vector.load %arg5[%c0_98, %c0_99] : memref<1x8xf32, #tpu.memory_space<vmem>>, vector<1x8xf32>
      %165 = arith.addf %163, %164 : vector<1x8xf32>
      %c0_100 = arith.constant 0 : index
      %c0_101 = arith.constant 0 : index
      %c0_102 = arith.constant 0 : index
      %166 = vector.load %arg2[%c0_100, %c0_101, %c0_102] : memref<1x1x32xf32, #tpu.memory_space<vmem>>, vector<1x1x32xf32>
      %167 = vector.shape_cast %166 : vector<1x1x32xf32> to vector<1x32xf32>
      %c0_103 = arith.constant 0 : index
      %c0_104 = arith.constant 0 : index
      %168 = vector.load %arg6[%c0_103, %c0_104] : memref<32x640xf32, #tpu.memory_space<vmem>>, vector<32x640xf32>
      %cst_105 = arith.constant dense<0.000000e+00> : vector<1x640xf32>
      %169 = tpu.matmul %167, %168, %cst_105 {dimension_numbers = #tpu.dot_dimension_numbers<[1], [0], [0], [1], [0, 0, 1, 1], [], []>} : vector<1x32xf32>, vector<32x640xf32>, vector<1x640xf32> -> vector<1x640xf32>
      %c0_106 = arith.constant 0 : index
      %c0_107 = arith.constant 0 : index
      %170 = vector.load %arg7[%c0_106, %c0_107] : memref<8x640xf32, #tpu.memory_space<vmem>>, vector<8x640xf32>
      %cst_108 = arith.constant dense<0.000000e+00> : vector<1x640xf32>
      %171 = tpu.matmul %165, %170, %cst_108 {dimension_numbers = #tpu.dot_dimension_numbers<[1], [0], [0], [1], [0, 0, 1, 1], [], []>} : vector<1x8xf32>, vector<8x640xf32>, vector<1x640xf32> -> vector<1x640xf32>
      %172 = arith.addf %169, %171 : vector<1x640xf32>
      %c0_109 = arith.constant 0 : index
      %c0_110 = arith.constant 0 : index
      %173 = vector.load %arg8[%c0_109, %c0_110] : memref<16x640xf32, #tpu.memory_space<vmem>>, vector<16x640xf32>
      %174 = vector.broadcast %172 : vector<1x640xf32> to vector<16x640xf32>
      %175 = arith.mulf %173, %174 : vector<16x640xf32>
      %c0_111 = arith.constant 0 : index
      %c0_112 = arith.constant 0 : index
      %176 = vector.load %arg9[%c0_111, %c0_112] : memref<640x20xf32, #tpu.memory_space<vmem>>, vector<640x20xf32>
      %cst_113 = arith.constant dense<0.000000e+00> : vector<16x20xf32>
      %177 = tpu.matmul %175, %176, %cst_113 {dimension_numbers = #tpu.dot_dimension_numbers<[1], [0], [0], [1], [0, 0, 1, 1], [], []>} : vector<16x640xf32>, vector<640x20xf32>, vector<16x20xf32> -> vector<16x20xf32>
      %c0_114 = arith.constant 0 : index
      %c0_115 = arith.constant 0 : index
      %178 = vector.load %arg10[%c0_114, %c0_115] : memref<16x20xf32, #tpu.memory_space<vmem>>, vector<16x20xf32>
      %179 = arith.addf %177, %178 : vector<16x20xf32>
      %c0_116 = arith.constant 0 : index
      %c0_117 = arith.constant 0 : index
      %180 = vector.load %arg32[%c0_116, %c0_117] : memref<16x20xf32, #tpu.memory_space<vmem>>, vector<16x20xf32>
      tpu.vector_store %arg32[%c0_116, %c0_117], %179 {strides = array<i32>} : memref<16x20xf32, #tpu.memory_space<vmem>>, vector<16x20xf32>,
    } else {
    }
    %c0 = arith.constant 0 : index
    %c0_1 = arith.constant 0 : index
    %3 = vector.load %arg32[%c0, %c0_1] : memref<16x20xf32, #tpu.memory_space<vmem>>, vector<16x20xf32>
    %c0_2 = arith.constant 0 : index
    %c0_3 = arith.constant 0 : index
    %4 = vector.load %arg11[%c0_2, %c0_3] : memref<80x20xf32, #tpu.memory_space<vmem>>, vector<80x20xf32>
    %c0_4 = arith.constant 0 : index
    %c0_5 = arith.constant 0 : index
    %c0_6 = arith.constant 0 : index
    %5 = vector.load %arg13[%c0_4, %c0_5, %c0_6] : memref<1x1x20xf32, #tpu.memory_space<vmem>>, vector<1x1x20xf32>
    %6 = vector.shape_cast %5 : vector<1x1x20xf32> to vector<1x20xf32>
    %c0_7 = arith.constant 0 : index
    %c0_8 = arith.constant 0 : index
    %c0_9 = arith.constant 0 : index
    %7 = vector.load %arg14[%c0_7, %c0_8, %c0_9] : memref<1x1x20xf32, #tpu.memory_space<vmem>>, vector<1x1x20xf32>
    %8 = vector.shape_cast %7 : vector<1x1x20xf32> to vector<1x20xf32>
    %cst = arith.constant dense<0.000000e+00> : vector<16xf32>
    %9 = vector.multi_reduction <add>, %3, %cst [1] : vector<16x20xf32> to vector<16xf32>
    %10 = vector.shape_cast %9 : vector<16xf32> to vector<16x1xf32>
    %cst_10 = arith.constant 2.000000e+01 : f32
    %11 = vector.broadcast %cst_10 : f32 to vector<16x1xf32>
    %12 = arith.divf %10, %11 : vector<16x1xf32>
    %13 = vector.broadcast %12 : vector<16x1xf32> to vector<16x20xf32>
    %14 = arith.subf %3, %13 : vector<16x20xf32>
    %15 = arith.mulf %14, %14 : vector<16x20xf32>
    %cst_11 = arith.constant dense<0.000000e+00> : vector<16xf32>
    %16 = vector.multi_reduction <add>, %15, %cst_11 [1] : vector<16x20xf32> to vector<16xf32>
    %17 = vector.shape_cast %16 : vector<16xf32> to vector<16x1xf32>
    %cst_12 = arith.constant 2.000000e+01 : f32
    %18 = vector.broadcast %cst_12 : f32 to vector<16x1xf32>
    %19 = arith.divf %17, %18 : vector<16x1xf32>
    %cst_13 = arith.constant 9.99999974E-6 : f32
    %20 = vector.broadcast %cst_13 : f32 to vector<16x1xf32>
    %21 = arith.addf %19, %20 : vector<16x1xf32>
    %22 = math.rsqrt %21 : vector<16x1xf32>
    %23 = vector.broadcast %22 : vector<16x1xf32> to vector<16x20xf32>
    %24 = arith.mulf %14, %23 : vector<16x20xf32>
    %25 = vector.broadcast %6 : vector<1x20xf32> to vector<16x20xf32>
    %26 = arith.mulf %24, %25 : vector<16x20xf32>
    %27 = vector.broadcast %8 : vector<1x20xf32> to vector<16x20xf32>
    %28 = arith.addf %26, %27 : vector<16x20xf32>
    %c0_14 = arith.constant 0 : index
    %c0_15 = arith.constant 0 : index
    %c0_16 = arith.constant 0 : index
    %29 = vector.load %arg15[%c0_14, %c0_15, %c0_16] : memref<1x20x20xf32, #tpu.memory_space<vmem>>, vector<1x20x20xf32>
    %30 = vector.shape_cast %29 : vector<1x20x20xf32> to vector<20x20xf32>
    %cst_17 = arith.constant dense<0.000000e+00> : vector<16x20xf32>
    %31 = tpu.matmul %28, %30, %cst_17 {dimension_numbers = #tpu.dot_dimension_numbers<[1], [0], [0], [1], [0, 0, 1, 1], [], []>} : vector<16x20xf32>, vector<20x20xf32>, vector<16x20xf32> -> vector<16x20xf32>
    %c0_18 = arith.constant 0 : index
    %c0_19 = arith.constant 0 : index
    %c0_20 = arith.constant 0 : index
    %32 = vector.load %arg16[%c0_18, %c0_19, %c0_20] : memref<1x1x20xf32, #tpu.memory_space<vmem>>, vector<1x1x20xf32>
    %33 = vector.shape_cast %32 : vector<1x1x20xf32> to vector<1x20xf32>
    %34 = vector.broadcast %33 : vector<1x20xf32> to vector<16x20xf32>
    %35 = arith.addf %31, %34 : vector<16x20xf32>
    %c0_21 = arith.constant 0 : index
    %c0_22 = arith.constant 0 : index
    %c0_23 = arith.constant 0 : index
    %36 = vector.load %arg17[%c0_21, %c0_22, %c0_23] : memref<1x20x20xf32, #tpu.memory_space<vmem>>, vector<1x20x20xf32>
    %37 = vector.shape_cast %36 : vector<1x20x20xf32> to vector<20x20xf32>
    %cst_24 = arith.constant dense<0.000000e+00> : vector<16x20xf32>
    %38 = tpu.matmul %28, %37, %cst_24 {dimension_numbers = #tpu.dot_dimension_numbers<[1], [0], [0], [1], [0, 0, 1, 1], [], []>} : vector<16x20xf32>, vector<20x20xf32>, vector<16x20xf32> -> vector<16x20xf32>
    %c0_25 = arith.constant 0 : index
    %c0_26 = arith.constant 0 : index
    %c0_27 = arith.constant 0 : index
    %39 = vector.load %arg18[%c0_25, %c0_26, %c0_27] : memref<1x1x20xf32, #tpu.memory_space<vmem>>, vector<1x1x20xf32>
    %40 = vector.shape_cast %39 : vector<1x1x20xf32> to vector<1x20xf32>
    %41 = vector.broadcast %40 : vector<1x20xf32> to vector<16x20xf32>
    %42 = arith.addf %38, %41 : vector<16x20xf32>
    %c0_28 = arith.constant 0 : index
    %c0_29 = arith.constant 0 : index
    %c0_30 = arith.constant 0 : index
    %43 = vector.load %arg19[%c0_28, %c0_29, %c0_30] : memref<1x20x20xf32, #tpu.memory_space<vmem>>, vector<1x20x20xf32>
    %44 = vector.shape_cast %43 : vector<1x20x20xf32> to vector<20x20xf32>
    %cst_31 = arith.constant dense<0.000000e+00> : vector<16x20xf32>
    %45 = tpu.matmul %28, %44, %cst_31 {dimension_numbers = #tpu.dot_dimension_numbers<[1], [0], [0], [1], [0, 0, 1, 1], [], []>} : vector<16x20xf32>, vector<20x20xf32>, vector<16x20xf32> -> vector<16x20xf32>
    %c0_32 = arith.constant 0 : index
    %c0_33 = arith.constant 0 : index
    %c0_34 = arith.constant 0 : index
    %46 = vector.load %arg20[%c0_32, %c0_33, %c0_34] : memref<1x1x20xf32, #tpu.memory_space<vmem>>, vector<1x1x20xf32>
    %47 = vector.shape_cast %46 : vector<1x1x20xf32> to vector<1x20xf32>
    %48 = vector.broadcast %47 : vector<1x20xf32> to vector<16x20xf32>
    %49 = arith.addf %45, %48 : vector<16x20xf32>
    %50 = tpu.concatenate %42, %42, %42, %42, %42 in 0 : vector<16x20xf32>, vector<16x20xf32>, vector<16x20xf32>, vector<16x20xf32>, vector<16x20xf32> -> vector<80x20xf32>
    %51 = arith.mulf %50, %4 : vector<80x20xf32>
    %52 = tpu.concatenate %49, %49, %49, %49, %49 in 0 : vector<16x20xf32>, vector<16x20xf32>, vector<16x20xf32>, vector<16x20xf32>, vector<16x20xf32> -> vector<80x20xf32>
    %53 = arith.mulf %52, %4 : vector<80x20xf32>
    %cst_35 = arith.constant dense<0.000000e+00> : vector<16x80xf32>
    %54 = tpu.matmul %35, %51, %cst_35 {dimension_numbers = #tpu.dot_dimension_numbers<[1], [1], [0], [0], [0, 0, 1, 0], [], []>} : vector<16x20xf32>, vector<80x20xf32>, vector<16x80xf32> -> vector<16x80xf32>
    %cst_36 = arith.constant 0.223606795 : f32
    %55 = vector.broadcast %cst_36 : f32 to vector<16x80xf32>
    %56 = arith.mulf %54, %55 : vector<16x80xf32>
    %cst_37 = arith.constant dense<0xFF800000> : vector<16xf32>
    %57 = vector.multi_reduction <maximumf>, %56, %cst_37 [1] : vector<16x80xf32> to vector<16xf32>
    %58 = vector.shape_cast %57 : vector<16xf32> to vector<16x1xf32>
    %59 = vector.broadcast %58 : vector<16x1xf32> to vector<16x80xf32>
    %60 = arith.subf %56, %59 : vector<16x80xf32>
    %61 = math.exp %60 : vector<16x80xf32>
    %c0_38 = arith.constant 0 : index
    %c0_39 = arith.constant 0 : index
    %62 = vector.load %arg12[%c0_38, %c0_39] : memref<80x80xf32, #tpu.memory_space<vmem>>, vector<80x80xf32>
    %cst_40 = arith.constant dense<0.000000e+00> : vector<16x80xf32>
    %63 = tpu.matmul %61, %62, %cst_40 {dimension_numbers = #tpu.dot_dimension_numbers<[1], [0], [0], [1], [0, 0, 1, 1], [], []>} : vector<16x80xf32>, vector<80x80xf32>, vector<16x80xf32> -> vector<16x80xf32>
    %64 = tpu.reciprocal %63 {approx = true} : vector<16x80xf32> -> vector<16x80xf32>
    %65 = arith.mulf %61, %64 : vector<16x80xf32>
    %cst_41 = arith.constant dense<0.000000e+00> : vector<16x20xf32>
    %66 = tpu.matmul %65, %53, %cst_41 {dimension_numbers = #tpu.dot_dimension_numbers<[1], [0], [0], [1], [0, 0, 1, 1], [], []>} : vector<16x80xf32>, vector<80x20xf32>, vector<16x20xf32> -> vector<16x20xf32>
    %c0_42 = arith.constant 0 : index
    %c0_43 = arith.constant 0 : index
    %c0_44 = arith.constant 0 : index
    %67 = vector.load %arg21[%c0_42, %c0_43, %c0_44] : memref<1x20x20xf32, #tpu.memory_space<vmem>>, vector<1x20x20xf32>
    %68 = vector.shape_cast %67 : vector<1x20x20xf32> to vector<20x20xf32>
    %cst_45 = arith.constant dense<0.000000e+00> : vector<16x20xf32>
    %69 = tpu.matmul %66, %68, %cst_45 {dimension_numbers = #tpu.dot_dimension_numbers<[1], [0], [0], [1], [0, 0, 1, 1], [], []>} : vector<16x20xf32>, vector<20x20xf32>, vector<16x20xf32> -> vector<16x20xf32>
    %70 = arith.addf %3, %69 : vector<16x20xf32>
    %c0_46 = arith.constant 0 : index
    %c0_47 = arith.constant 0 : index
    %c0_48 = arith.constant 0 : index
    %71 = vector.load %arg22[%c0_46, %c0_47, %c0_48] : memref<1x1x20xf32, #tpu.memory_space<vmem>>, vector<1x1x20xf32>
    %72 = vector.shape_cast %71 : vector<1x1x20xf32> to vector<1x20xf32>
    %73 = vector.broadcast %72 : vector<1x20xf32> to vector<16x20xf32>
    %74 = arith.addf %70, %73 : vector<16x20xf32>
    %c0_49 = arith.constant 0 : index
    %c0_50 = arith.constant 0 : index
    %c0_51 = arith.constant 0 : index
    %75 = vector.load %arg23[%c0_49, %c0_50, %c0_51] : memref<1x1x20xf32, #tpu.memory_space<vmem>>, vector<1x1x20xf32>
    %76 = vector.shape_cast %75 : vector<1x1x20xf32> to vector<1x20xf32>
    %c0_52 = arith.constant 0 : index
    %c0_53 = arith.constant 0 : index
    %c0_54 = arith.constant 0 : index
    %77 = vector.load %arg24[%c0_52, %c0_53, %c0_54] : memref<1x1x20xf32, #tpu.memory_space<vmem>>, vector<1x1x20xf32>
    %78 = vector.shape_cast %77 : vector<1x1x20xf32> to vector<1x20xf32>
    %cst_55 = arith.constant dense<0.000000e+00> : vector<16xf32>
    %79 = vector.multi_reduction <add>, %74, %cst_55 [1] : vector<16x20xf32> to vector<16xf32>
    %80 = vector.shape_cast %79 : vector<16xf32> to vector<16x1xf32>
    %cst_56 = arith.constant 2.000000e+01 : f32
    %81 = vector.broadcast %cst_56 : f32 to vector<16x1xf32>
    %82 = arith.divf %80, %81 : vector<16x1xf32>
    %83 = vector.broadcast %82 : vector<16x1xf32> to vector<16x20xf32>
    %84 = arith.subf %74, %83 : vector<16x20xf32>
    %85 = arith.mulf %84, %84 : vector<16x20xf32>
    %cst_57 = arith.constant dense<0.000000e+00> : vector<16xf32>
    %86 = vector.multi_reduction <add>, %85, %cst_57 [1] : vector<16x20xf32> to vector<16xf32>
    %87 = vector.shape_cast %86 : vector<16xf32> to vector<16x1xf32>
    %cst_58 = arith.constant 2.000000e+01 : f32
    %88 = vector.broadcast %cst_58 : f32 to vector<16x1xf32>
    %89 = arith.divf %87, %88 : vector<16x1xf32>
    %cst_59 = arith.constant 9.99999974E-6 : f32
    %90 = vector.broadcast %cst_59 : f32 to vector<16x1xf32>
    %91 = arith.addf %89, %90 : vector<16x1xf32>
    %92 = math.rsqrt %91 : vector<16x1xf32>
    %93 = vector.broadcast %92 : vector<16x1xf32> to vector<16x20xf32>
    %94 = arith.mulf %84, %93 : vector<16x20xf32>
    %95 = vector.broadcast %76 : vector<1x20xf32> to vector<16x20xf32>
    %96 = arith.mulf %94, %95 : vector<16x20xf32>
    %97 = vector.broadcast %78 : vector<1x20xf32> to vector<16x20xf32>
    %98 = arith.addf %96, %97 : vector<16x20xf32>
    %c0_60 = arith.constant 0 : index
    %c0_61 = arith.constant 0 : index
    %c0_62 = arith.constant 0 : index
    %99 = vector.load %arg25[%c0_60, %c0_61, %c0_62] : memref<1x20x80xf32, #tpu.memory_space<vmem>>, vector<1x20x80xf32>
    %100 = vector.shape_cast %99 : vector<1x20x80xf32> to vector<20x80xf32>
    %cst_63 = arith.constant dense<0.000000e+00> : vector<16x80xf32>
    %101 = tpu.matmul %98, %100, %cst_63 {dimension_numbers = #tpu.dot_dimension_numbers<[1], [0], [0], [1], [0, 0, 1, 1], [], []>} : vector<16x20xf32>, vector<20x80xf32>, vector<16x80xf32> -> vector<16x80xf32>
    %c0_64 = arith.constant 0 : index
    %c0_65 = arith.constant 0 : index
    %c0_66 = arith.constant 0 : index
    %102 = vector.load %arg26[%c0_64, %c0_65, %c0_66] : memref<1x1x80xf32, #tpu.memory_space<vmem>>, vector<1x1x80xf32>
    %103 = vector.shape_cast %102 : vector<1x1x80xf32> to vector<1x80xf32>
    %104 = vector.broadcast %103 : vector<1x80xf32> to vector<16x80xf32>
    %105 = arith.addf %101, %104 : vector<16x80xf32>
    %cst_67 = arith.constant 5.000000e-01 : f32
    %106 = vector.broadcast %cst_67 : f32 to vector<16x80xf32>
    %107 = arith.mulf %106, %105 : vector<16x80xf32>
    %cst_68 = arith.constant 0.707106769 : f32
    %108 = vector.broadcast %cst_68 : f32 to vector<16x80xf32>
    %109 = arith.mulf %105, %108 : vector<16x80xf32>
    %cst_69 = arith.constant 0.000000e+00 : f32
    %110 = vector.broadcast %cst_69 : f32 to vector<16x80xf32>
    %111 = arith.cmpf olt, %109, %110 : vector<16x80xf32>
    %cst_70 = arith.constant -1.000000e+00 : f32
    %cst_71 = arith.constant 1.000000e+00 : f32
    %112 = vector.broadcast %cst_70 : f32 to vector<16x80xf32>
    %113 = vector.broadcast %cst_71 : f32 to vector<16x80xf32>
    %114 = arith.select %111, %112, %113 : vector<16x80xi1>, vector<16x80xf32>
    %115 = math.absf %109 : vector<16x80xf32>
    %cst_72 = arith.constant 0.327591091 : f32
    %116 = vector.broadcast %cst_72 : f32 to vector<16x80xf32>
    %117 = arith.mulf %116, %115 : vector<16x80xf32>
    %cst_73 = arith.constant 1.000000e+00 : f32
    %118 = vector.broadcast %cst_73 : f32 to vector<16x80xf32>
    %119 = arith.addf %118, %117 : vector<16x80xf32>
    %cst_74 = arith.constant 1.000000e+00 : f32
    %120 = vector.broadcast %cst_74 : f32 to vector<16x80xf32>
    %121 = arith.divf %120, %119 : vector<16x80xf32>
    %cst_75 = arith.constant 1.06140542 : f32
    %122 = vector.broadcast %cst_75 : f32 to vector<16x80xf32>
    %123 = arith.mulf %122, %121 : vector<16x80xf32>
    %cst_76 = arith.constant -1.45315206 : f32
    %124 = vector.broadcast %cst_76 : f32 to vector<16x80xf32>
    %125 = arith.addf %123, %124 : vector<16x80xf32>
    %126 = arith.mulf %125, %121 : vector<16x80xf32>
    %cst_77 = arith.constant 1.42141378 : f32
    %127 = vector.broadcast %cst_77 : f32 to vector<16x80xf32>
    %128 = arith.addf %126, %127 : vector<16x80xf32>
    %129 = arith.mulf %128, %121 : vector<16x80xf32>
    %cst_78 = arith.constant -0.284496725 : f32
    %130 = vector.broadcast %cst_78 : f32 to vector<16x80xf32>
    %131 = arith.addf %129, %130 : vector<16x80xf32>
    %132 = arith.mulf %131, %121 : vector<16x80xf32>
    %cst_79 = arith.constant 0.254829586 : f32
    %133 = vector.broadcast %cst_79 : f32 to vector<16x80xf32>
    %134 = arith.addf %132, %133 : vector<16x80xf32>
    %135 = arith.mulf %134, %121 : vector<16x80xf32>
    %cst_80 = arith.constant 0.000000e+00 : f32
    %136 = vector.broadcast %cst_80 : f32 to vector<16x80xf32>
    %137 = arith.subf %136, %115 : vector<16x80xf32>
    %138 = arith.mulf %137, %115 : vector<16x80xf32>
    %139 = math.exp %138 : vector<16x80xf32>
    %140 = arith.mulf %135, %139 : vector<16x80xf32>
    %cst_81 = arith.constant 1.000000e+00 : f32
    %141 = vector.broadcast %cst_81 : f32 to vector<16x80xf32>
    %142 = arith.subf %141, %140 : vector<16x80xf32>
    %143 = arith.mulf %114, %142 : vector<16x80xf32>
    %cst_82 = arith.constant 1.000000e+00 : f32
    %144 = vector.broadcast %cst_82 : f32 to vector<16x80xf32>
    %145 = arith.addf %144, %143 : vector<16x80xf32>
    %146 = arith.mulf %107, %145 : vector<16x80xf32>
    %c0_83 = arith.constant 0 : index
    %c0_84 = arith.constant 0 : index
    %c0_85 = arith.constant 0 : index
    %147 = vector.load %arg27[%c0_83, %c0_84, %c0_85] : memref<1x80x20xf32, #tpu.memory_space<vmem>>, vector<1x80x20xf32>
    %148 = vector.shape_cast %147 : vector<1x80x20xf32> to vector<80x20xf32>
    %cst_86 = arith.constant dense<0.000000e+00> : vector<16x20xf32>
    %149 = tpu.matmul %146, %148, %cst_86 {dimension_numbers = #tpu.dot_dimension_numbers<[1], [0], [0], [1], [0, 0, 1, 1], [], []>} : vector<16x80xf32>, vector<80x20xf32>, vector<16x20xf32> -> vector<16x20xf32>
    %150 = arith.addf %74, %149 : vector<16x20xf32>
    %c0_87 = arith.constant 0 : index
    %c0_88 = arith.constant 0 : index
    %c0_89 = arith.constant 0 : index
    %151 = vector.load %arg28[%c0_87, %c0_88, %c0_89] : memref<1x1x20xf32, #tpu.memory_space<vmem>>, vector<1x1x20xf32>
    %152 = vector.shape_cast %151 : vector<1x1x20xf32> to vector<1x20xf32>
    %153 = vector.broadcast %152 : vector<1x20xf32> to vector<16x20xf32>
    %154 = arith.addf %150, %153 : vector<16x20xf32>
    %c0_90 = arith.constant 0 : index
    %c0_91 = arith.constant 0 : index
    %155 = vector.load %arg32[%c0_90, %c0_91] : memref<16x20xf32, #tpu.memory_space<vmem>>, vector<16x20xf32>
    tpu.vector_store %arg32[%c0_90, %c0_91], %154 {strides = array<i32>} : memref<16x20xf32, #tpu.memory_space<vmem>>, vector<16x20xf32>,
    %c1_i32 = arith.constant 1 : i32
    %156 = arith.cmpi eq, %arg1, %c1_i32 : i32
    %157 = arith.extui %156 : i1 to i32
    %c0_i32_92 = arith.constant 0 : i32
    %158 = arith.cmpi ne, %157, %c0_i32_92 : i32
    scf.if %158 {
      %c0_93 = arith.constant 0 : index
      %c0_94 = arith.constant 0 : index
      %159 = vector.load %arg29[%c0_93, %c0_94] : memref<20x128xf32, #tpu.memory_space<vmem>>, vector<20x128xf32>
      %cst_95 = arith.constant dense<0.000000e+00> : vector<16x128xf32>
      %160 = tpu.matmul %154, %159, %cst_95 {dimension_numbers = #tpu.dot_dimension_numbers<[1], [0], [0], [1], [0, 0, 1, 1], [], []>} : vector<16x20xf32>, vector<20x128xf32>, vector<16x128xf32> -> vector<16x128xf32>
      %c0_96 = arith.constant 0 : index
      %c0_97 = arith.constant 0 : index
      %161 = vector.load %arg30[%c0_96, %c0_97] : memref<1x128xf32, #tpu.memory_space<vmem>>, vector<1x128xf32>
      %162 = vector.broadcast %161 : vector<1x128xf32> to vector<16x128xf32>
      %163 = arith.addf %160, %162 : vector<16x128xf32>
      %c0_98 = arith.constant 0 : index
      %c0_99 = arith.constant 0 : index
      %c0_100 = arith.constant 0 : index
      %164 = vector.load %arg31[%c0_98, %c0_99, %c0_100] : memref<1x16x128xf32, #tpu.memory_space<vmem>>, vector<1x16x128xf32>
      %165 = vector.shape_cast %164 : vector<1x16x128xf32> to vector<16x128xf32>
      %166 = vector.shape_cast %163 : vector<16x128xf32> to vector<1x16x128xf32>
      tpu.vector_store %arg31[%c0_98, %c0_99, %c0_100], %166 {strides = array<i32>} : memref<1x16x128xf32, #tpu.memory_space<vmem>>, vector<1x16x128xf32>,
    } else {
    }
    return
  }
  func.func @transform_0(%arg0: i32, %arg1: i32) -> (i32, i32, i32) {
    %c0_i32 = arith.constant 0 : i32
    %c0_i32_0 = arith.constant 0 : i32
    %c0_i32_1 = arith.constant 0 : i32
    return %arg0, %c0_i32, %c0_i32_0 : i32, i32, i32
  }
  func.func @transform_1(%arg0: i32, %arg1: i32) -> (i32, i32, i32) {
    %c0_i32 = arith.constant 0 : i32
    %c0_i32_0 = arith.constant 0 : i32
    %c0_i32_1 = arith.constant 0 : i32
    return %arg0, %c0_i32, %c0_i32_0 : i32, i32, i32
  }
  func.func @transform_2(%arg0: i32, %arg1: i32) -> (i32, i32) {
    %c0_i32 = arith.constant 0 : i32
    %c0_i32_0 = arith.constant 0 : i32
    %c0_i32_1 = arith.constant 0 : i32
    return %c0_i32, %c0_i32_0 : i32, i32
  }
  func.func @transform_3(%arg0: i32, %arg1: i32) -> (i32, i32) {
    %c0_i32 = arith.constant 0 : i32
    %c0_i32_0 = arith.constant 0 : i32
    %c0_i32_1 = arith.constant 0 : i32
    return %c0_i32, %c0_i32_0 : i32, i32
  }
  func.func @transform_4(%arg0: i32, %arg1: i32) -> (i32, i32) {
    %c0_i32 = arith.constant 0 : i32
    %c0_i32_0 = arith.constant 0 : i32
    %c0_i32_1 = arith.constant 0 : i32
    return %c0_i32, %c0_i32_0 : i32, i32
  }
  func.func @transform_5(%arg0: i32, %arg1: i32) -> (i32, i32) {
    %c0_i32 = arith.constant 0 : i32
    %c0_i32_0 = arith.constant 0 : i32
    %c0_i32_1 = arith.constant 0 : i32
    return %c0_i32, %c0_i32_0 : i32, i32
  }
  func.func @transform_6(%arg0: i32, %arg1: i32) -> (i32, i32) {
    %c0_i32 = arith.constant 0 : i32
    %c0_i32_0 = arith.constant 0 : i32
    %c0_i32_1 = arith.constant 0 : i32
    return %c0_i32, %c0_i32_0 : i32, i32
  }
  func.func @transform_7(%arg0: i32, %arg1: i32) -> (i32, i32) {
    %c0_i32 = arith.constant 0 : i32
    %c0_i32_0 = arith.constant 0 : i32
    %c0_i32_1 = arith.constant 0 : i32
    return %c0_i32, %c0_i32_0 : i32, i32
  }
  func.func @transform_8(%arg0: i32, %arg1: i32) -> (i32, i32) {
    %c0_i32 = arith.constant 0 : i32
    %c0_i32_0 = arith.constant 0 : i32
    %c0_i32_1 = arith.constant 0 : i32
    return %c0_i32, %c0_i32_0 : i32, i32
  }
  func.func @transform_9(%arg0: i32, %arg1: i32) -> (i32, i32) {
    %c0_i32 = arith.constant 0 : i32
    %c0_i32_0 = arith.constant 0 : i32
    %c0_i32_1 = arith.constant 0 : i32
    return %c0_i32, %c0_i32_0 : i32, i32
  }
  func.func @transform_10(%arg0: i32, %arg1: i32) -> (i32, i32) {
    %c0_i32 = arith.constant 0 : i32
    %c0_i32_0 = arith.constant 0 : i32
    %c0_i32_1 = arith.constant 0 : i32
    return %c0_i32, %c0_i32_0 : i32, i32
  }
  func.func @transform_11(%arg0: i32, %arg1: i32) -> (i32, i32, i32) {
    %c0_i32 = arith.constant 0 : i32
    %c0_i32_0 = arith.constant 0 : i32
    %c0_i32_1 = arith.constant 0 : i32
    return %arg1, %c0_i32, %c0_i32_0 : i32, i32, i32
  }
  func.func @transform_12(%arg0: i32, %arg1: i32) -> (i32, i32, i32) {
    %c0_i32 = arith.constant 0 : i32
    %c0_i32_0 = arith.constant 0 : i32
    %c0_i32_1 = arith.constant 0 : i32
    return %arg1, %c0_i32, %c0_i32_0 : i32, i32, i32
  }
  func.func @transform_13(%arg0: i32, %arg1: i32) -> (i32, i32, i32) {
    %c0_i32 = arith.constant 0 : i32
    %c0_i32_0 = arith.constant 0 : i32
    %c0_i32_1 = arith.constant 0 : i32
    return %arg1, %c0_i32, %c0_i32_0 : i32, i32, i32
  }
  func.func @transform_14(%arg0: i32, %arg1: i32) -> (i32, i32, i32) {
    %c0_i32 = arith.constant 0 : i32
    %c0_i32_0 = arith.constant 0 : i32
    %c0_i32_1 = arith.constant 0 : i32
    return %arg1, %c0_i32, %c0_i32_0 : i32, i32, i32
  }
  func.func @transform_15(%arg0: i32, %arg1: i32) -> (i32, i32, i32) {
    %c0_i32 = arith.constant 0 : i32
    %c0_i32_0 = arith.constant 0 : i32
    %c0_i32_1 = arith.constant 0 : i32
    return %arg1, %c0_i32, %c0_i32_0 : i32, i32, i32
  }
  func.func @transform_16(%arg0: i32, %arg1: i32) -> (i32, i32, i32) {
    %c0_i32 = arith.constant 0 : i32
    %c0_i32_0 = arith.constant 0 : i32
    %c0_i32_1 = arith.constant 0 : i32
    return %arg1, %c0_i32, %c0_i32_0 : i32, i32, i32
  }
  func.func @transform_17(%arg0: i32, %arg1: i32) -> (i32, i32, i32) {
    %c0_i32 = arith.constant 0 : i32
    %c0_i32_0 = arith.constant 0 : i32
    %c0_i32_1 = arith.constant 0 : i32
    return %arg1, %c0_i32, %c0_i32_0 : i32, i32, i32
  }
  func.func @transform_18(%arg0: i32, %arg1: i32) -> (i32, i32, i32) {
    %c0_i32 = arith.constant 0 : i32
    %c0_i32_0 = arith.constant 0 : i32
    %c0_i32_1 = arith.constant 0 : i32
    return %arg1, %c0_i32, %c0_i32_0 : i32, i32, i32
  }
  func.func @transform_19(%arg0: i32, %arg1: i32) -> (i32, i32, i32) {
    %c0_i32 = arith.constant 0 : i32
    %c0_i32_0 = arith.constant 0 : i32
    %c0_i32_1 = arith.constant 0 : i32
    return %arg1, %c0_i32, %c0_i32_0 : i32, i32, i32
  }
  func.func @transform_20(%arg0: i32, %arg1: i32) -> (i32, i32, i32) {
    %c0_i32 = arith.constant 0 : i32
    %c0_i32_0 = arith.constant 0 : i32
    %c0_i32_1 = arith.constant 0 : i32
    return %arg1, %c0_i32, %c0_i32_0 : i32, i32, i32
  }
  func.func @transform_21(%arg0: i32, %arg1: i32) -> (i32, i32, i32) {
    %c0_i32 = arith.constant 0 : i32
    %c0_i32_0 = arith.constant 0 : i32
    %c0_i32_1 = arith.constant 0 : i32
    return %arg1, %c0_i32, %c0_i32_0 : i32, i32, i32
  }
  func.func @transform_22(%arg0: i32, %arg1: i32) -> (i32, i32, i32) {
    %c0_i32 = arith.constant 0 : i32
    %c0_i32_0 = arith.constant 0 : i32
    %c0_i32_1 = arith.constant 0 : i32
    return %arg1, %c0_i32, %c0_i32_0 : i32, i32, i32
  }
  func.func @transform_23(%arg0: i32, %arg1: i32) -> (i32, i32, i32) {
    %c0_i32 = arith.constant 0 : i32
    %c0_i32_0 = arith.constant 0 : i32
    %c0_i32_1 = arith.constant 0 : i32
    return %arg1, %c0_i32, %c0_i32_0 : i32, i32, i32
  }
  func.func @transform_24(%arg0: i32, %arg1: i32) -> (i32, i32, i32) {
    %c0_i32 = arith.constant 0 : i32
    %c0_i32_0 = arith.constant 0 : i32
    %c0_i32_1 = arith.constant 0 : i32
    return %arg1, %c0_i32, %c0_i32_0 : i32, i32, i32
  }
  func.func @transform_25(%arg0: i32, %arg1: i32) -> (i32, i32, i32) {
    %c0_i32 = arith.constant 0 : i32
    %c0_i32_0 = arith.constant 0 : i32
    %c0_i32_1 = arith.constant 0 : i32
    return %arg1, %c0_i32, %c0_i32_0 : i32, i32, i32
  }
  func.func @transform_26(%arg0: i32, %arg1: i32) -> (i32, i32, i32) {
    %c0_i32 = arith.constant 0 : i32
    %c0_i32_0 = arith.constant 0 : i32
    %c0_i32_1 = arith.constant 0 : i32
    return %arg1, %c0_i32, %c0_i32_0 : i32, i32, i32
  }
  func.func @transform_27(%arg0: i32, %arg1: i32) -> (i32, i32) {
    %c0_i32 = arith.constant 0 : i32
    %c0_i32_0 = arith.constant 0 : i32
    %c0_i32_1 = arith.constant 0 : i32
    return %c0_i32, %c0_i32_0 : i32, i32
  }
  func.func @transform_28(%arg0: i32, %arg1: i32) -> (i32, i32) {
    %c0_i32 = arith.constant 0 : i32
    %c0_i32_0 = arith.constant 0 : i32
    %c0_i32_1 = arith.constant 0 : i32
    return %c0_i32, %c0_i32_0 : i32, i32
  }
  func.func @transform_29(%arg0: i32, %arg1: i32) -> (i32, i32, i32) {
    %c0_i32 = arith.constant 0 : i32
    %c0_i32_0 = arith.constant 0 : i32
    %c0_i32_1 = arith.constant 0 : i32
    return %arg0, %c0_i32, %c0_i32_0 : i32, i32, i32
  }
}

</mosaic_0001>

<bundles_post_ra>
// kernel: tpu_custom_call.1
= control target key start
LH: loop header
LB: loop body
LE: loop exit
PB: predicated region body
PF: predicated region fallthrough
CT: control target
= control target key end

     0   :  { %s4112_s6 = smov 1   ;;  %s4113_s10 = smov 2   ;;  %s4832_s0 = inlined_call_operand.smem [shape: u32[30], index: -1, kind: input, shape index: {}] }
   0x1   :  { %s4156_s5 = sld [smem:[%s4832_s0]]   ;;  %s4114_s14 = smov 3  }
   0x2   :  { %s4161_s9 = sld [smem:[%s4832_s0 + %s4112_s6]]   ;;  %s4115_s18 = smov 4  }
   0x3   :  { %s4166_s13 = sld [smem:[%s4832_s0 + %s4113_s10]]   ;;  %s4116_s22 = smov 5  }
   0x4   :  { %s4171_s17 = sld [smem:[%s4832_s0 + %s4114_s14]]   ;;  %s4117_s26 = smov 6  }
   0x5   :  { %s4176_s21 = sld [smem:[%s4832_s0 + %s4115_s18]]   ;;  %s4118_s30 = smov 7  }
   0x6   :  { %s4181_s25 = sld [smem:[%s4832_s0 + %s4116_s22]]   ;;  %s4119_s4 = smov 8  }
   0x7   :  { %4857 = sst [smem:[#allocation6_spill]] %s4156_s5  ;;  %s4120_s10 = smov 9  }
   0x8   :  { %4858 = sst [smem:[#allocation7_spill]] %s4161_s9  ;;  %s4121_s15 = smov 10  }
   0x9   :  { %4859 = sst [smem:[#allocation8_spill]] %s4166_s13  ;;  %s4122_s20 = smov 11  }
   0xa   :  { %4860 = sst [smem:[#allocation9_spill]] %s4171_s17  ;;  %s4124_s1 = smov 13  }
   0xb   :  { %4861 = sst [smem:[#allocation10_spill]] %s4176_s21  ;;  %s4125_s7 = smov 14  }
   0xc   :  { %4862 = sst [smem:[#allocation11_spill]] %s4181_s25  ;;  %s4127_s22 = smov 16  }
   0xd   :  { %s4186_s29 = sld [smem:[%s4832_s0 + %s4117_s26]]   ;;  %s4123_s26 = smov 12  }
   0xe   :  { %s4191_s3 = sld [smem:[%s4832_s0 + %s4118_s30]]   ;;  %s4128_s28 = smov 17  }
   0xf   :  { %s4196_s8 = sld [smem:[%s4832_s0 + %s4119_s4]]  }
  0x10   :  { %s4201_s14 = sld [smem:[%s4832_s0 + %s4120_s10]]  }
  0x11   :  { %s4206_s19 = sld [smem:[%s4832_s0 + %s4121_s15]]   ;;  %s4126_s15 = smov 15  }
  0x12   :  { %s4211_s24 = sld [smem:[%s4832_s0 + %s4122_s20]]  }
  0x13   :  { %4863 = sst [smem:[#allocation12_spill]] %s4186_s29 }
  0x14   :  { %4864 = sst [smem:[#allocation13_spill]] %s4191_s3 }
  0x15   :  { %4865 = sst [smem:[#allocation14_spill]] %s4196_s8 }
  0x16   :  { %4866 = sst [smem:[#allocation15_spill]] %s4201_s14 }
  0x17   :  { %4867 = sst [smem:[#allocation16_spill]] %s4206_s19 }
  0x18   :  { %4868 = sst [smem:[#allocation17_spill]] %s4211_s24 }
  0x19   :  { %s4216_s30 = sld [smem:[%s4832_s0 + %s4123_s26]]  }
  0x1a   :  { %s4221_s6 = sld [smem:[%s4832_s0 + %s4124_s1]]  }
  0x1b   :  { %s4226_s12 = sld [smem:[%s4832_s0 + %s4125_s7]]   ;;  %s4129_s7 = smov 18  }
  0x1c   :  { %s4231_s20 = sld [smem:[%s4832_s0 + %s4126_s15]]   ;;  %s4130_s15 = smov 19  }
  0x1d   :  { %s4236_s27 = sld [smem:[%s4832_s0 + %s4127_s22]]   ;;  %s4131_s22 = smov 20  }
  0x1e   :  { %s4241_s4 = sld [smem:[%s4832_s0 + %s4128_s28]]   ;;  %s4132_s28 = smov 21  }
  0x1f   :  { %4869 = sst [smem:[#allocation18_spill]] %s4216_s30 }
  0x20   :  { %s4246_s14 = sld [smem:[%s4832_s0 + %s4129_s7]]   ;;  %s4133_s7 = smov 22  }
  0x21   :  { %4870 = sst [smem:[#allocation19_spill]] %s4226_s12 }
  0x22   :  { %s4251_s19 = sld [smem:[%s4832_s0 + %s4130_s15]]   ;;  %s4134_s15 = smov 23  }
  0x23   :  { %s4256_s8 = sld [smem:[%s4832_s0 + %s4131_s22]]   ;;  %s4135_s22 = smov 24  }
  0x24   :  { %4871 = sst [smem:[#allocation20_spill]] %s4241_s4 }
  0x25   :  { %s4261_s29 = sld [smem:[%s4832_s0 + %s4132_s28]]   ;;  %s4136_s28 = smov 25  }
  0x26   :  { %s4266_s21 = sld [smem:[%s4832_s0 + %s4133_s7]]   ;;  %s4137_s7 = smov 26  }
  0x27   :  { %s4271_s17 = sld [smem:[%s4832_s0 + %s4134_s15]]   ;;  %s4138_s15 = smov 27  }
  0x28   :  { %s4276_s13 = sld [smem:[%s4832_s0 + %s4135_s22]]   ;;  %s4139_s22 = smov 28  }
  0x29   :  { %s4281_s3 = sld [smem:[%s4832_s0 + %s4136_s28]]   ;;  %s4140_s28 = smov 29  }
  0x2a   :  { %s4286_s25 = sld [smem:[%s4832_s0 + %s4137_s7]]  }
  0x2d   :  { %4872 = sst [smem:[#allocation21_spill]] %s4271_s17 }
  0x2e   :  { %4873 = sst [smem:[#allocation22_spill]] %s4276_s13 }
  0x2f   :  { %4874 = sst [smem:[#allocation23_spill]] %s4281_s3 }
  0x30   :  { %s4291_s17 = sld [smem:[%s4832_s0 + %s4138_s15]]  }
  0x31   :  { %s4296_s13 = sld [smem:[%s4832_s0 + %s4139_s22]]  }
  0x32   :  { %s4301_s3 = sld [smem:[%s4832_s0 + %s4140_s28]]  }
  0x36   :  { %4875 = sst [smem:[#allocation24_spill]] %s4291_s17 }
  0x37   :  { %4876 = sst [smem:[#allocation25_spill]] %s4296_s13 }
  0x38   :  { %4877 = sst [smem:[#allocation26_spill]] %s4301_s3 }
  0x39   :  { %64 = vsyncpa [#allocation4], 0 }
  0x3a   :  { %66 = vsyncpa [#allocation4 + $0x1], 0  ;;  %s4303_s7 = smov 0   ;;  %s4305_s10 = smov 0  }
  0x3b   :  { %s4307_s11 = smov 0   ;;  %s4309_s15 = smov 0  }
  0x3c   :  { %s4311_s16 = smov 0   ;;  %s4313_s18 = smov 0  }
  0x3d   :  { %s4315_s22 = smov 0   ;;  %s4317_s23 = smov 0  }
  0x3e LB: > { %4878 = sst [smem:[#allocation27_spill]] %s4082_s7  ;;  %s3436_s0 = sadd.s32 4294967295, %s4110_s23   ;;  %s4110_s23 = sphi %s4317_s23, %s72_s23   ;;  %s4106_s22 = sphi %s4315_s22, %s4946_s22   ;;  %s4102_s18 = sphi %s4313_s18, %s4945_s18   ;;  %s4098_s16 = sphi %s4311_s16, %s4944_s16   ;;  %s4094_s15 = sphi %s4309_s15, %s4943_s15   ;;  %s4090_s11 = sphi %s4307_s11, %s4942_s11   ;;  %s4086_s10 = sphi %s4305_s10, %s4941_s10   ;;  %s4082_s7 = sphi %s4303_s7, %s4940_s7  }
  0x3f   : > { %4879 = sst [smem:[#allocation28_spill]] %s4086_s10  ;;  %s3437_s26 = sadd.s32 4294967294, %s4110_s23  }
  0x40   : > { %4880 = sst [smem:[#allocation29_spill]] %s4090_s11  ;;  %s81_s28 = sadd.s32 1, %s4102_s18 }
  0x41   : > { %4881 = sst [smem:[#allocation30_spill]] %s4094_s15  ;;  %p82_p0 = scmp.ge.s32.totalorder %s81_s28, 2 }
  0x42   : > { %4882 = sst [smem:[#allocation31_spill]] %s4098_s16  ;;  %s84_s1 = sadd.s32 1, %s4106_s22 }
  0x43   : > { %4883 = sst [smem:[#allocation32_spill]] %s4102_s18  ;;  %p800_p1 = scmp.ne.s32.totalorder %s4090_s11, %s4086_s10 }
  0x44   : > { %4884 = sst [smem:[#allocation33_spill]] %s4106_s22  ;;  %p801_p2 = scmp.eq.s32.totalorder %s3436_s0, 3 }
  0x45   : > { %4885 = sst [smem:[#allocation34_spill]] %s4110_s23  ;;  %s4948_s28 = smov (%p82_p0, %s81_s28), 0 }
  0x46   : > { %4886 = sst [smem:[#allocation35_spill]] %s4948_s28  ;;  %s4950_s1 = smov (!%p82_p0, %s84_s1), %s4106_s22 }
  0x47   : > { %p4352_p3 = por %p801_p2, %p800_p1  ;;  %p806_p4 = scmp.ne.s32.totalorder %s4086_s10, %s4082_s7 }
  0x48   : > { %p86_p5 = scmp.ge.s32.totalorder %s4950_s1, 2  ;;  %p807_p6 = scmp.eq.s32.totalorder %s3437_s26, 3 }
  0x49   : > { %s4887_s2 = scalar_select %p4352_p3, 1, 0 }
  0x4a   : > { %p3440_p7 = scmp.ge.s32.totalorder %s4110_s23, 1  ;;  %p978_p8 = scmp.lt.s32.totalorder %s4110_s23, 5 }
  0x4b   : > { %4888 = sst [smem:[#allocation36_spill]] %s4887_s2  ;;  %s4952_s1 = smov (%p86_p5, %s4950_s1), 0 }
  0x4c   : > { %4889 = sst [smem:[#allocation37_spill]] %s4952_s1  ;;  %p4362_p9 = por %p807_p6, %p806_p4 }
  0x4d   : > { %p979_p10 = pnand %p3440_p7, %p978_p8  ;;  %s787_s0 = ssub.s32 %s4106_s22, %s4952_s1 }
  0x4e   : > { %s4890_s18 = scalar_select %p4362_p9, 1, 0 }
  0x4f   : > { %s790_s28 = sadd.s32 1, %s4090_s11  ;;  %p788_p11 = scmp.eq.s32.totalorder %s787_s0, 0 }
  0x50   : > { %4891 = sst [smem:[#allocation38_spill]] %s4890_s18  ;;  %982 = sbr.rel (%p979_p10) target bundleno = 3199 (0xc7f), region = 136 }
  0x51   : > { %s4370_s3 = scalar_select %p788_p11, %s4090_s11, %s790_s28  }
  0x53   : > { %4892 = sst [smem:[#allocation39_spill]] %s4370_s3 }
  0x55   : > { %s4894_s9 = sld [smem:[#allocation7_spill]]  ;;  %s4843_s26 = sand.u32 1, %s4086_s10  }
  0x56   : > { %s4898_s4 = sld [smem:[#allocation20_spill]]  ;;  %p1115_p12 = scmp.lt.s32.totalorder %s4098_s16, 1 }
  0x57   : > { %s3441_s28 = sshll.u32 %s4843_s26, 4  ;;  %p1121_p13 = scmp.lt.s32.totalorder %s4094_s15, 1 }
  0x58   : > { %s4378_s0 = scalar_select %p1115_p12, %s4098_s16, 1 }
  0x59   : > { %s4381_s1 = scalar_select %p1121_p13, %s4094_s15, 1 }
  0x5a   : > { %4899 = sst [smem:[#allocation40_spill]] %s4378_s0  ;;  %s4427_s16 = scalar_lea.vmem [#allocation3], %s3441_s28 }
  0x5b   : > { %s4900_s26 = sld [smem:[#allocation21_spill]]  ;;  %s1120_s11 = scalar_lea.vmem %s4894_s9, %s4378_s0 }
  0x5c   : > { %s4901_s3 = sld [smem:[#allocation22_spill]]  ;;  %s3885_s2 = smul.u32 24, %s4381_s1 }
  0x5d   : > { %s4902_s23 = sld [smem:[#allocation23_spill]]  ;;  %s1158_s0 = scalar_lea.vmem %s4256_s8, %s4381_s1 }
  0x5e   : > { %s4399_s17 = scalar_lea.vmem %s4221_s6, %s3885_s2  ;;  %s4402_s15 = scalar_lea.vmem %s4231_s20, %s3885_s2 }
  0x5f   : > { %s4405_s5 = scalar_lea.vmem %s4898_s4, %s3885_s2  ;;  %s4408_s22 = scalar_lea.vmem %s4251_s19, %s3885_s2 }
  0x60   : > { %s1164_s18 = scalar_lea.vmem %s4266_s21, %s4381_s1  ;;  %s3886_s30 = smul.u32 80, %s4381_s1 }
  0x61   : > { %s4417_s24 = scalar_lea.vmem %s4900_s26, %s3885_s2  ;;  %s1180_s10 = scalar_lea.vmem %s4286_s25, %s4381_s1 }
  0x62   : > { %s1172_s7 = scalar_lea.vmem %s4901_s3, %s4381_s1  ;;  %s4903_s13 = sld [smem:[#allocation30_spill]] }
  0x63   : > { %s4425_s12 = scalar_lea.vmem %s4902_s23, %s3886_s30 }
  0x68   : > { %p3448_p0 = scmp.ne.s32.totalorder %s4903_s13, 0 }
  0x69   : > { %s4904_s4 = sld [smem:[#allocation11_spill]] (!%p3448_p0) }
  0x6a   : > { %1184 = sbr.rel (%p3448_p0) target bundleno = 687 (0x2af), region = 140  ;;  %s4905_s9 = sld [smem:[#allocation13_spill]] (!%p3448_p0) }
  0x6b   : > { %s4906_s3 = sld [smem:[#allocation8_spill]] (!%p3448_p0) }
  0x6c   : > { %s4907_s30 = sld [smem:[#allocation9_spill]] (!%p3448_p0) }
  0x6d   : > { %s4908_s13 = sld [smem:[#allocation10_spill]] (!%p3448_p0) }
  0x6e   : > { %s4910_s23 = sld [smem:[#allocation40_spill]] (!%p3448_p0) }
  0x6f   : > { %v1185_v0 = vld [vmem:[%s1120_s11] sm:$0x1]  ;;  %v4141_v1 = vmov 0   ;;  %v1221_v2 = vld [vmem:[%s4904_s4 + $0x8] sm:$0xff]  ;;  %v1223_v4 = vld [vmem:[%s4904_s4 + $0x18] sm:$0xff]  ;;  %v4142_v6 = vmov 0.0   ;;  %v1192_v8 = vlaneseq }
  0x70   : > { %3993 = vset.pattern.permute.xlu0 %v4141_v1  ;;  %1259 = vmatprep.subr.mxu1 %v1221_v2  ;;  %v1220_v3 = vld [vmem:[%s4904_s4] sm:$0xff]  ;;  %vm4143_vm0 = vmmov 0   ;;  %v1728_v7 = vld [vmem:[%s4905_s9 + $0xf8] sm:$0xff]  ;;  %vm1225_vm1 = vcmask 64512   ;;  %v1222_v17 = vld [vmem:[%s4904_s4 + $0x10] sm:$0xff]  ;;  %s4909_s11 = sld [smem:[#allocation6_spill]] }
  0x71   : > { %1189 = vperm.xlu0 %3993, %v1185_v0   ;;  %v1224_v5 = vld [vmem:[%s4904_s4 + $0x20] sm:$0xff]  ;;  %1260 = vmatpush1.msra.mxu1 %v1220_v3  ;;  %v1193_v9 = vshrl.u32 %v1192_v8, 7  ;;  %v1712_v19 = vld [vmem:[%s4905_s9 + $0x78] sm:$0xff]  ;;  %v1727_v20 = vld [vmem:[%s4905_s9 + $0xf0] sm:$0xff]  ;;  %vm1441_vm2 = vcmask 261120   ;;  %s4912_s26 = sld [smem:[#allocation12_spill]] }
  0x72   : > { %3688 = vmatprep.subr.mxu0 %v4142_v6  ;;  %1293 = vmatprep.mubr.f32.mxu1 %v4142_v6  ;;  %v1186_v11 = vld [vmem:[%s4906_s3] sm:$0x1]  ;;  %v1711_v21 = vld [vmem:[%s4905_s9 + $0x70] sm:$0xff]  ;;  %v1726_v24 = vld [vmem:[%s4905_s9 + $0xe8] sm:$0xff]  ;;  %s4913_s28 = sld [smem:[#allocation14_spill]]  ;;  %vm2004_vm3 = vcmask 162816  }
  0x73   : > { %1330 = vmatprep.subr.mxu1 %v1223_v4  ;;  %3689 = vmatpush3.msra.mxu0 %v1224_v5  ;;  %v4439_v10 = vsub.s32 0, %v1193_v9  ;;  %v1197_v14 = vld [vmem:[%s4907_s30] sm:$0x1]  ;;  %v1215_v22 = vld [vmem:[%s4908_s13 + $0x78] sm:$0xff]  ;;  %v1210_v25 = vld [vmem:[%s4908_s13 + $0x50] sm:$0xff] }
  0x74   : > { %3690 = vmatprep.mubr.msk.f32.mxu0 %vm4143_vm0, %v4142_v6  ;;  %3516 = vmatprep.subr.mxu0 %v1728_v7  ;;  %v1216_v18 = vld [vmem:[%s4908_s13 + $0x80] sm:$0xff]  ;;  %v1211_v23 = vld [vmem:[%s4908_s13 + $0x58] sm:$0xff]  ;;  %v1710_v26 = vld [vmem:[%s4905_s9 + $0x68] sm:$0xff] }
  0x75   : > { %v1206_v27 = vld [vmem:[%s4908_s13 + $0x30] sm:$0xff]  ;;  %v1725_v28 = vld [vmem:[%s4905_s9 + $0xe0] sm:$0xff]  ;;  %v1205_v29 = vld [vmem:[%s4908_s13 + $0x28] sm:$0xff] }
  0x76   : > { %v1709_v30 = vld [vmem:[%s4905_s9 + $0x60] sm:$0xff]  ;;  %v1201_v31 = vld [vmem:[%s4908_s13 + $0x8] sm:$0xff]  ;;  %v1724_v32 = vld [vmem:[%s4905_s9 + $0xd8] sm:$0xff]  ;;  %s4911_s2 = scalar_lea.vmem %s4909_s11, %s4910_s23 }
  0x77   : > { %v1200_v33 = vld [vmem:[%s4908_s13] sm:$0xff]  ;;  %v1708_v34 = vld [vmem:[%s4905_s9 + $0x58] sm:$0xff]  ;;  %v1218_v36 = vld [vmem:[%s4908_s13 + $0x90] sm:$0xff] }
  0x78   : > { %v1199_v35 = vld [vmem:[%s4911_s2] sm:$0x1]  ;;  %v1217_v37 = vld [vmem:[%s4908_s13 + $0x88] sm:$0xff]  ;;  %v1723_v39 = vld [vmem:[%s4905_s9 + $0xd0] sm:$0xff] }
  0x79   : > { %v1213_v38 = vld [vmem:[%s4908_s13 + $0x68] sm:$0xff]  ;;  %v1212_v40 = vld [vmem:[%s4908_s13 + $0x60] sm:$0xff]  ;;  %v1707_v41 = vld [vmem:[%s4905_s9 + $0x50] sm:$0xff] }
  0x7a   : > { %v1208_v42 = vld [vmem:[%s4908_s13 + $0x40] sm:$0xff]  ;;  %v1207_v43 = vld [vmem:[%s4908_s13 + $0x38] sm:$0xff]  ;;  %v1202_v45 = vld [vmem:[%s4908_s13 + $0x10] sm:$0xff] }
  0x7b   : > { %v1203_v44 = vld [vmem:[%s4908_s13 + $0x18] sm:$0xff]  ;;  %v1214_v47 = vld [vmem:[%s4908_s13 + $0x70] sm:$0xff]  ;;  %v1209_v48 = vld [vmem:[%s4908_s13 + $0x48] sm:$0xff] }
  0x7c   : > { %v1219_v46 = vld [vmem:[%s4908_s13 + $0x98] sm:$0xff]  ;;  %v1204_v49 = vld [vmem:[%s4908_s13 + $0x20] sm:$0xff]  ;;  %v1759_v52 = vld [vmem:[%s4905_s9 + $0x1f0] sm:$0xff] }
  0x7d   : > { %v1760_v50 = vld [vmem:[%s4905_s9 + $0x1f8] sm:$0xff]  ;;  %v1722_v53 = vld [vmem:[%s4905_s9 + $0xc8] sm:$0xff]  ;;  %v1743_v54 = vld [vmem:[%s4905_s9 + $0x170] sm:$0xff] }
  0x7e   : > { %v1744_v51 = vld [vmem:[%s4905_s9 + $0x178] sm:$0xff]  ;;  %v1706_v55 = vld [vmem:[%s4905_s9 + $0x48] sm:$0xff]  ;;  %v1721_v57 = vld [vmem:[%s4905_s9 + $0xc0] sm:$0xff] }
  0x7f   : > { %v1758_v56 = vld [vmem:[%s4905_s9 + $0x1e8] sm:$0xff]  ;;  %v1705_v59 = vld [vmem:[%s4905_s9 + $0x40] sm:$0xff]  ;;  %v1720_v61 = vld [vmem:[%s4905_s9 + $0xb8] sm:$0xff] }
  0x80   : > { %v1742_v58 = vld [vmem:[%s4905_s9 + $0x168] sm:$0xff]  ;;  %v1757_v60 = vld [vmem:[%s4905_s9 + $0x1e0] sm:$0xff]  ;;  %v1704_v63 = vld [vmem:[%s4905_s9 + $0x38] sm:$0xff] }
  0x81   : > { %v1741_v62 = vld [vmem:[%s4905_s9 + $0x160] sm:$0xff]  ;;  %v1756_v0 = vld [vmem:[%s4905_s9 + $0x1d8] sm:$0xff]  ;;  %v1719_v1 = vld [vmem:[%s4905_s9 + $0xb0] sm:$0xff] }
  0x82   : > { %v1740_v2 = vld [vmem:[%s4905_s9 + $0x158] sm:$0xff]  ;;  %v1703_v3 = vld [vmem:[%s4905_s9 + $0x30] sm:$0xff]  ;;  %v1718_v5 = vld [vmem:[%s4905_s9 + $0xa8] sm:$0xff] }
  0x83   : > { %v1755_v4 = vld [vmem:[%s4905_s9 + $0x1d0] sm:$0xff]  ;;  %v1702_v7 = vld [vmem:[%s4905_s9 + $0x28] sm:$0xff]  ;;  %v1717_v9 = vld [vmem:[%s4905_s9 + $0xa0] sm:$0xff] }
  0x84   : > { %v1754_v8 = vld [vmem:[%s4905_s9 + $0x1c8] sm:$0xff] }
  0xec   : > { %v1190_v12 = vpop.permute.xlu0 %1189 }
  0xed   : > { %v1195_v13 = vrot.slane %v1190_v12, %v4439_v10  ;;  %v1701_v12 = vld [vmem:[%s4905_s9 + $0x20] sm:$0xff] }
  0xef   : > { %v1196_v15 = vmul.f32 %v1195_v13, %v1186_v11  ;;  %v1738_v11 = vld [vmem:[%s4905_s9 + $0x148] sm:$0xff]  ;;  %v1753_v13 = vld [vmem:[%s4905_s9 + $0x1c0] sm:$0xff] }
  0xf1   : > { %v1198_v16 = vadd.f32 %v1197_v14, %v1196_v15  ;;  %v1716_v14 = vld [vmem:[%s4905_s9 + $0x98] sm:$0xff]  ;;  %v1737_v15 = vld [vmem:[%s4905_s9 + $0x140] sm:$0xff] }
  0xf3   : > { %3449 = vmatmul.mubr.msk.f32.vlgmr.msra.gmra.mxu1 %vm1225_vm1, %v1198_v16  ;;  %3691 = vmatmul.mubr.msk.f32.vlgmr.msra.gmra.mxu0 %vm1225_vm1, %v1198_v16 }
  0xf4   : > { %1331 = vmatpush1.msra.mxu1 %v1222_v17  ;;  %1364 = vmatprep.mubr.f32.mxu1 %v4142_v6  ;;  %v1752_v17 = vld [vmem:[%s4905_s9 + $0x1b8] sm:$0xff] }
  0xf5   : > { %1469 = vmatprep.subr.mxu1 %v1216_v18  ;;  %3517 = vmatpush3.msra.mxu0 %v1712_v19  ;;  %v1715_v18 = vld [vmem:[%s4905_s9 + $0x90] sm:$0xff]  ;;  %v1736_v19 = vld [vmem:[%s4905_s9 + $0x138] sm:$0xff] }
  0xf6   : > { %3518 = vmatprep.subr.mxu0 %v1727_v20  ;;  %v1699_v20 = vld [vmem:[%s4905_s9 + $0x10] sm:$0xff] }
  0xf7   : > { %3450 = vmatmul.mubr.msk.f32.vlgmr.msra.gmra.mxu1 %vm1225_vm1, %v1198_v16  ;;  %3519 = vmatpush3.msra.mxu0 %v1711_v21  ;;  %v1700_v16 = vld [vmem:[%s4905_s9 + $0x18] sm:$0xff]  ;;  %v1751_v21 = vld [vmem:[%s4905_s9 + $0x1b0] sm:$0xff] }
  0xf8   : > { %1470 = vmatpush1.msra.mxu1 %v1215_v22  ;;  %1509 = vmatprep.mubr.f32.mxu1 %v4142_v6  ;;  %v1714_v22 = vld [vmem:[%s4905_s9 + $0x88] sm:$0xff] }
  0xf9   : > { %1471 = vmatprep.subr.mxu1 %v1211_v23  ;;  %3520 = vmatprep.subr.mxu0 %v1726_v24  ;;  %v1735_v23 = vld [vmem:[%s4905_s9 + $0x130] sm:$0xff]  ;;  %v1698_v24 = vld [vmem:[%s4905_s9 + $0x8] sm:$0xff] }
  0xfa   : > { %1472 = vmatpush1.msra.mxu1 %v1210_v25  ;;  %3521 = vmatpush3.msra.mxu0 %v1710_v26  ;;  %v1750_v25 = vld [vmem:[%s4905_s9 + $0x1a8] sm:$0xff]  ;;  %v1713_v26 = vld [vmem:[%s4905_s9 + $0x80] sm:$0xff] }
  0xfb   : > { %1473 = vmatprep.subr.mxu1 %v1206_v27  ;;  %3522 = vmatprep.subr.mxu0 %v1725_v28  ;;  %v1734_v27 = vld [vmem:[%s4905_s9 + $0x128] sm:$0xff]  ;;  %v1697_v28 = vld [vmem:[%s4905_s9] sm:$0xff] }
  0xfc   : > { %1474 = vmatpush1.msra.mxu1 %v1205_v29  ;;  %3523 = vmatpush3.msra.mxu0 %v1709_v30  ;;  %v1749_v29 = vld [vmem:[%s4905_s9 + $0x1a0] sm:$0xff] }
  0xfd   : > { %1475 = vmatprep.subr.mxu1 %v1201_v31  ;;  %3524 = vmatprep.subr.mxu0 %v1724_v32  ;;  %v1733_v30 = vld [vmem:[%s4905_s9 + $0x120] sm:$0xff]  ;;  %v1776_v31 = vld [vmem:[%s4905_s9 + $0x278] sm:$0xff] }
  0xfe   : > { %1476 = vmatpush1.msra.mxu1 %v1200_v33  ;;  %3525 = vmatpush3.msra.mxu0 %v1708_v34  ;;  %v1748_v32 = vld [vmem:[%s4905_s9 + $0x198] sm:$0xff]  ;;  %v1747_v34 = vld [vmem:[%s4905_s9 + $0x190] sm:$0xff] }
  0xff   : > { %3452 = vmatmul.mubr.msk.f32.vlgmr.msra.gmra.mxu1 %vm1441_vm2, %v1199_v35  ;;  %1540 = vmatprep.subr.mxu1 %v1218_v36  ;;  %v1732_v33 = vld [vmem:[%s4905_s9 + $0x118] sm:$0xff]  ;;  %v1746_v36 = vld [vmem:[%s4905_s9 + $0x188] sm:$0xff] }
 0x100   : > { %1541 = vmatpush1.msra.mxu1 %v1217_v37  ;;  %1580 = vmatprep.mubr.f32.mxu1 %v4142_v6  ;;  %v1730_v37 = vld [vmem:[%s4905_s9 + $0x108] sm:$0xff] }
 0x101   : > { %1542 = vmatprep.subr.mxu1 %v1213_v38  ;;  %3526 = vmatprep.subr.mxu0 %v1723_v39  ;;  %v1745_v38 = vld [vmem:[%s4905_s9 + $0x180] sm:$0xff] }
 0x102   : > { %1543 = vmatpush1.msra.mxu1 %v1212_v40  ;;  %3527 = vmatpush3.msra.mxu0 %v1707_v41  ;;  %v1729_v39 = vld [vmem:[%s4905_s9 + $0x100] sm:$0xff] }
 0x103   : > { %1544 = vmatprep.subr.mxu1 %v1208_v42  ;;  %3528 = vmatprep.subr.mxu0 %v1722_v53 }
 0x104   : > { %1545 = vmatpush1.msra.mxu1 %v1207_v43  ;;  %3529 = vmatpush3.msra.mxu0 %v1706_v55 }
 0x105   : > { %1546 = vmatprep.subr.mxu1 %v1203_v44  ;;  %3530 = vmatprep.subr.mxu0 %v1721_v57 }
 0x106   : > { %1547 = vmatpush1.msra.mxu1 %v1202_v45  ;;  %3531 = vmatpush3.msra.mxu0 %v1705_v59 }
 0x107   : > { %3453 = vmatmul.mubr.msk.f32.vlgmr.msra.gmra.mxu1 %vm1441_vm2, %v1199_v35  ;;  %3693 = vmatprep.subr.mxu1 %v4142_v6 }
 0x108   : > { %3694 = vmatpush3.msra.mxu1 %v1219_v46  ;;  %3701 = vmatprep.mubr.msk.f32.mxu1 %vm4143_vm0, %v4142_v6 }
 0x109   : > { %3695 = vmatprep.subr.mxu1 %v4142_v6  ;;  %3532 = vmatprep.subr.mxu0 %v1720_v61  ;;  %v1662_v61 = vld [vmem:[%s4912_s26 + $0x28] sm:$0xff] }
 0x10a   : > { %3696 = vmatpush3.msra.mxu1 %v1214_v47  ;;  %3533 = vmatpush3.msra.mxu0 %v1704_v63 }
 0x10b   : > { %3697 = vmatprep.subr.mxu1 %v4142_v6  ;;  %3534 = vmatprep.subr.mxu0 %v1719_v1 }
 0x10c   : > { %3698 = vmatpush3.msra.mxu1 %v1209_v48  ;;  %3535 = vmatpush3.msra.mxu0 %v1703_v3  ;;  %v1660_v3 = vld [vmem:[%s4912_s26 + $0x18] sm:$0xff] }
 0x10d   : > { %3699 = vmatprep.subr.mxu1 %v4142_v6  ;;  %v1739_v6 = vld [vmem:[%s4905_s9 + $0x150] sm:$0xff]  ;;  %3536 = vmatprep.subr.mxu0 %v1718_v5 }
 0x10e   : > { %3700 = vmatpush3.msra.mxu1 %v1204_v49  ;;  %3537 = vmatpush3.msra.mxu0 %v1702_v7  ;;  %v1665_v7 = vld [vmem:[%s4912_s26 + $0x40] sm:$0xff] }
 0x10f   : > { %3702 = vmatmul.mubr.msk.f32.vlgmr.msra.gmra.mxu1 %vm1441_vm2, %v1199_v35  ;;  %3554 = vmatprep.subr.mxu1 %v1760_v50  ;;  %v1731_v35 = vld [vmem:[%s4905_s9 + $0x110] sm:$0xff] }
 0x110   : > { %3555 = vmatpush3.msra.mxu1 %v1744_v51  ;;  %3538 = vmatprep.subr.mxu0 %v1717_v9  ;;  %v1658_v51 = vld [vmem:[%s4912_s26 + $0x8] sm:$0xff]  ;;  %v1772_v9 = vld [vmem:[%s4905_s9 + $0x258] sm:$0xff] }
 0x111   : > { %3556 = vmatprep.subr.mxu1 %v1759_v52  ;;  %3539 = vmatpush3.msra.mxu0 %v1701_v12  ;;  %v1657_v52 = vld [vmem:[%s4912_s26] sm:$0xff] }
 0x112   : > { %3557 = vmatpush3.msra.mxu1 %v1743_v54  ;;  %3540 = vmatprep.subr.mxu0 %v1716_v14  ;;  %v1663_v54 = vld [vmem:[%s4912_s26 + $0x30] sm:$0xff] }
 0x113   : > { %3558 = vmatprep.subr.mxu1 %v1758_v56  ;;  %3541 = vmatpush3.msra.mxu0 %v1700_v16  ;;  %v1664_v16 = vld [vmem:[%s4912_s26 + $0x38] sm:$0xff] }
 0x114   : > { %3559 = vmatpush3.msra.mxu1 %v1742_v58  ;;  %3542 = vmatprep.subr.mxu0 %v1715_v18 }
 0x115   : > { %3560 = vmatprep.subr.mxu1 %v1757_v60  ;;  %3543 = vmatpush3.msra.mxu0 %v1699_v20  ;;  %v1775_v60 = vld [vmem:[%s4905_s9 + $0x270] sm:$0xff]  ;;  %v1770_v20 = vld [vmem:[%s4905_s9 + $0x248] sm:$0xff] }
 0x116   : > { %3561 = vmatpush3.msra.mxu1 %v1741_v62  ;;  %3544 = vmatprep.subr.mxu0 %v1714_v22  ;;  %v1769_v22 = vld [vmem:[%s4905_s9 + $0x240] sm:$0xff] }
 0x117   : > { %3562 = vmatprep.subr.mxu1 %v1756_v0  ;;  %3545 = vmatpush3.msra.mxu0 %v1698_v24  ;;  %v1774_v0 = vld [vmem:[%s4905_s9 + $0x268] sm:$0xff]  ;;  %v1768_v24 = vld [vmem:[%s4905_s9 + $0x238] sm:$0xff] }
 0x118   : > { %3563 = vmatpush3.msra.mxu1 %v1740_v2  ;;  %3546 = vmatprep.subr.mxu0 %v1713_v26  ;;  %v1765_v26 = vld [vmem:[%s4905_s9 + $0x220] sm:$0xff] }
 0x119   : > { %3564 = vmatprep.subr.mxu1 %v1755_v4  ;;  %3547 = vmatpush3.msra.mxu0 %v1697_v28  ;;  %v1659_v4 = vld [vmem:[%s4912_s26 + $0x10] sm:$0xff] }
 0x11a   : > { %3565 = vmatpush3.msra.mxu1 %v1739_v6  ;;  %3704 = vmatprep.subr.mxu0 %v1776_v31  ;;  %v1773_v6 = vld [vmem:[%s4905_s9 + $0x260] sm:$0xff]  ;;  %v1763_v28 = vld [vmem:[%s4905_s9 + $0x210] sm:$0xff] }
 0x11b   : > { %3566 = vmatprep.subr.mxu1 %v1754_v8 }
 0x11c   : > { %3567 = vmatpush3.msra.mxu1 %v1738_v11 }
 0x11d   : > { %3568 = vmatprep.subr.mxu1 %v1753_v13 }
 0x11e   : > { %3569 = vmatpush3.msra.mxu1 %v1737_v15  ;;  %v1771_v15 = vld [vmem:[%s4905_s9 + $0x250] sm:$0xff] }
 0x11f   : > { %3570 = vmatprep.subr.mxu1 %v1752_v17  ;;  %v1661_v17 = vld [vmem:[%s4912_s26 + $0x20] sm:$0xff] }
 0x120   : > { %3571 = vmatpush3.msra.mxu1 %v1736_v19 }
 0x121   : > { %3572 = vmatprep.subr.mxu1 %v1751_v21 }
 0x122   : > { %3573 = vmatpush3.msra.mxu1 %v1735_v23 }
 0x123   : > { %3574 = vmatprep.subr.mxu1 %v1750_v25  ;;  %v1766_v25 = vld [vmem:[%s4905_s9 + $0x228] sm:$0xff] }
 0x124   : > { %3575 = vmatpush3.msra.mxu1 %v1734_v27  ;;  %v1764_v27 = vld [vmem:[%s4905_s9 + $0x218] sm:$0xff] }
 0x125   : > { %3576 = vmatprep.subr.mxu1 %v1749_v29  ;;  %v1762_v29 = vld [vmem:[%s4905_s9 + $0x208] sm:$0xff] }
 0x126   : > { %3577 = vmatpush3.msra.mxu1 %v1733_v30  ;;  %v1666_v30 = vld [vmem:[%s4912_s26 + $0x48] sm:$0xff] }
 0x127   : > { %3578 = vmatprep.subr.mxu1 %v1748_v32 }
 0x128   : > { %3579 = vmatpush3.msra.mxu1 %v1732_v33 }
 0x129   : > { %3580 = vmatprep.subr.mxu1 %v1747_v34 }
 0x12a   : > { %3581 = vmatpush3.msra.mxu1 %v1731_v35 }
 0x12b   : > { %3582 = vmatprep.subr.mxu1 %v1746_v36 }
 0x12c   : > { %3583 = vmatpush3.msra.mxu1 %v1730_v37 }
 0x12d   : > { %3584 = vmatprep.subr.mxu1 %v1745_v38 }
 0x12e   : > { %3585 = vmatpush3.msra.mxu1 %v1729_v39 }
 0x1b3   : > { %v1295_v40 = vpop.f32.mrf.mxu1  ;;  %v1437_v41 = vpop.f32.mrf.mxu0 }
 0x1b5   : > { %v1297_v42 = vpop.f32.mrf.mxu1  ;;  %v3692_v43 = vpop.f32.mrf.mxu0 }
 0x1b7   : > { %v1366_v44 = vpop.f32.mrf.mxu1 }
 0x1b9   : > { %v1368_v45 = vpop.f32.mrf.mxu1 }
 0x1bf   : > { %v1511_v46 = vpop.f32.mrf.mxu1 }
 0x1c0   : > { %v1512_v47 = vadd.f32 %v1511_v46, %v1295_v40 }
 0x1c1   : > { %v1513_v48 = vpop.f32.mrf.mxu1 }
 0x1c2   : > { %v1514_v49 = vadd.f32 %v1513_v48, %v1297_v42  ;;  %v1670_v50 = vrot.slane %v1512_v47, %v4439_v10  ;;  %v1778_v42 = vld [vmem:[%s4913_s28 + $0x8] sm:$0xff] }
 0x1c4   : > { %v1674_v53 = vrot.slane %v1514_v49, %v4439_v10  ;;  %v1687_v56 = vmul.f32 %v1670_v50, %v1657_v52  ;;  %v1692_v2 = vmul.f32 %v1670_v50, %v1662_v61 }
 0x1c6   : > { %v1688_v55 = vmul.f32 %v1674_v53, %v1658_v51  ;;  %v1693_v59 = vmul.f32 %v1674_v53, %v1663_v54 }
 0x1c7   : > { %v1582_v57 = vpop.f32.mrf.mxu1 }
 0x1c8   : > { %v1583_v58 = vadd.f32 %v1582_v57, %v1366_v44  ;;  %1843 = vmatprep.mubr.f32.mxu0 %v1688_v55 }
 0x1c9   : > { %v1584_v62 = vpop.f32.mrf.mxu1  ;;  %1844 = vmatmul.mubr.f32.vlgmr.msra.gmra.mxu0 %v1687_v56 }
 0x1ca   : > { %v1585_v63 = vadd.f32 %v1584_v62, %v1368_v45  ;;  %3705 = vmatpush3.msra.mxu0 %v1776_v31  ;;  %1848 = vmatprep.mubr.f32.mxu0 %v1693_v59  ;;  %v1678_v1 = vrot.slane %v1583_v58, %v4439_v10  ;;  %v1761_v31 = vld [vmem:[%s4905_s9 + $0x200] sm:$0xff] }
 0x1cb   : > { %3706 = vmatprep.subr.mxu0 %v1775_v60  ;;  %v1777_v45 = vld [vmem:[%s4913_s28] sm:$0xff] }
 0x1cc   : > { %v1682_v5 = vrot.slane %v1585_v63, %v4439_v10  ;;  %3707 = vmatpush3.msra.mxu0 %v1775_v60  ;;  %v1689_v11 = vmul.f32 %v1678_v1, %v1659_v4  ;;  %v1694_v21 = vmul.f32 %v1678_v1, %v1664_v16 }
 0x1cd   : > { %3708 = vmatprep.subr.mxu0 %v1774_v0  ;;  %1849 = vmatmul.mubr.f32.gmra.mxu0 %v1692_v2 }
 0x1ce   : > { %3709 = vmatpush3.msra.mxu0 %v1774_v0  ;;  %v1690_v8 = vmul.f32 %v1682_v5, %v1660_v3  ;;  %v1695_v14 = vmul.f32 %v1682_v5, %v1665_v7 }
 0x1cf   : > { %3710 = vmatprep.subr.mxu0 %v1773_v6  ;;  %v1653_v12 = vpop.f32.mrf.mxu1 }
 0x1d0   : > { %v1654_v13 = vadd.f32 %v1653_v12, %v1437_v41  ;;  %3711 = vmatpush3.msra.mxu0 %v1773_v6  ;;  %1918 = vmatprep.mubr.f32.mxu1 %v1690_v8 }
 0x1d1   : > { %3712 = vmatprep.subr.mxu0 %v1772_v9  ;;  %1919 = vmatmul.mubr.f32.vlgmr.msra.gmra.mxu1 %v1689_v11  ;;  %v3703_v18 = vpop.f32.mrf.mxu1 }
 0x1d2   : > { %v1686_v19 = vrot.slane %v1654_v13, %v4439_v10  ;;  %3713 = vmatpush3.msra.mxu0 %v1772_v9  ;;  %1923 = vmatprep.mubr.f32.mxu1 %v1695_v14  ;;  %v1767_v10 = vld [vmem:[%s4905_s9 + $0x230] sm:$0xff] }
 0x1d3   : > { %3714 = vmatprep.subr.mxu0 %v1771_v15 }
 0x1d4   : > { %3715 = vmatpush3.msra.mxu0 %v1771_v15  ;;  %v1691_v23 = vmul.f32 %v1686_v19, %v1661_v17  ;;  %v1696_v32 = vmul.f32 %v1686_v19, %v1666_v30 }
 0x1d5   : > { %3716 = vmatprep.subr.mxu0 %v1770_v20  ;;  %1924 = vmatmul.mubr.f32.gmra.mxu1 %v1694_v21 }
 0x1d6   : > { %3717 = vmatpush3.msra.mxu0 %v1770_v20  ;;  %3736 = vmatprep.mubr.f32.mxu0 %v1691_v23 }
 0x1d7   : > { %3718 = vmatprep.subr.mxu0 %v1769_v22 }
 0x1d8   : > { %3719 = vmatpush3.msra.mxu0 %v1769_v22 }
 0x1d9   : > { %3720 = vmatprep.subr.mxu0 %v1768_v24 }
 0x1da   : > { %3721 = vmatpush3.msra.mxu0 %v1768_v24 }
 0x1db   : > { %3722 = vmatprep.subr.mxu0 %v1767_v10 }
 0x1dc   : > { %3723 = vmatpush3.msra.mxu0 %v1767_v10 }
 0x1dd   : > { %3724 = vmatprep.subr.mxu0 %v1766_v25 }
 0x1de   : > { %3725 = vmatpush3.msra.mxu0 %v1766_v25 }
 0x1df   : > { %3726 = vmatprep.subr.mxu0 %v1765_v26 }
 0x1e0   : > { %3727 = vmatpush3.msra.mxu0 %v1765_v26 }
 0x1e1   : > { %3728 = vmatprep.subr.mxu0 %v1764_v27 }
 0x1e2   : > { %3729 = vmatpush3.msra.mxu0 %v1764_v27 }
 0x1e3   : > { %3730 = vmatprep.subr.mxu0 %v1763_v28 }
 0x1e4   : > { %3731 = vmatpush3.msra.mxu0 %v1763_v28 }
 0x1e5   : > { %3732 = vmatprep.subr.mxu0 %v1762_v29 }
 0x1e6   : > { %3733 = vmatpush3.msra.mxu0 %v1762_v29 }
 0x1e7   : > { %3734 = vmatprep.subr.mxu0 %v1761_v31 }
 0x1e8   : > { %3735 = vmatpush3.msra.mxu0 %v1761_v31 }
 0x1e9   : > { %3737 = vmatmul.mubr.f32.vlgmr.msra.gmra.mxu0 %v1696_v32 }
 0x289   : > { %v3548_v33 = vpop.f32.mrf.mxu0 }
 0x28b   : > { %v3549_v35 = vpop.f32.mrf.mxu0 }
 0x28c   : > { %v3550_v43 = vadd.f32 %v3549_v35, %v3548_v33 }
 0x28d   : > { %v3551_v37 = vpop.f32.mrf.mxu0 }
 0x28e   : > { %v1846_v48 = vadd.f32 %v3550_v43, %v1777_v45 }
 0x28f   : > { %v3552_v39 = vpop.f32.mrf.mxu0 }
 0x290   : > { %v3553_v41 = vadd.f32 %v3552_v39, %v3551_v37 }
 0x291   : > { %v3586_v34 = vpop.f32.mrf.mxu1 }
 0x292   : > { %v1851_v46 = vadd.f32 %v3553_v41, %v1778_v42 }
 0x293   : > { %v3587_v36 = vpop.f32.mrf.mxu1 }
 0x294   : > { %v3588_v47 = vadd.f32 %v3587_v36, %v3586_v34 }
 0x295   : > { %v3589_v38 = vpop.f32.mrf.mxu1 }
 0x296   : > { %v1921_v52 = vadd.f32 %v3588_v47, %v1846_v48 }
 0x297   : > { %v3590_v40 = vpop.f32.mrf.mxu1 }
 0x298   : > { %v3591_v44 = vadd.f32 %v3590_v40, %v3589_v38 }
 0x29a   : > { %v1926_v49 = vadd.f32 %v3591_v44, %v1851_v46 }
 0x2a9   : > { %v3738_v50 = vpop.f32.mrf.mxu0 }
 0x2aa   : > { %v2001_v51 = vadd.f32 %v3738_v50, %v1926_v49 }
 0x2ab   : > { %v1995_v53 = vpop.f32.mrf.mxu0 }
 0x2ac   : > { %2006 = vst.msk [vmem:[#allocation2 + $0x8] sm:$0xff] %vm2004_vm3, %v2001_v51  ;;  %v1996_v54 = vadd.f32 %v1995_v53, %v1921_v52 }
 0x2ae   : > { %2005 = vst.msk [vmem:[#allocation2] sm:$0xff] %vm2004_vm3, %v1996_v54 }
 0x2af PF: > { %vm2021_vm4 = vcmask 162816   ;;  %v2067_v5 = vld [vmem:[%s4399_s17 + $0x10] sm:$0xf]  ;;  %vm2081_vm5 = vcmask 1043456   ;;  %v2066_v6 = vld [vmem:[%s4399_s17 + $0x8] sm:$0xff]  ;;  %s4914_s3 = sld [smem:[#allocation17_spill]] }
 0x2b0   : > { %3739 = vmatprep.subr.msk.mxu0 %vm2081_vm5, %v2067_v5  ;;  %v2065_v7 = vld [vmem:[%s4399_s17] sm:$0xff]  ;;  %s4915_s30 = sld [smem:[#allocation18_spill]]  ;;  %v2162_v8 = vld [vmem:[%s4402_s15 + $0x10] sm:$0xf]  ;;  %v2161_v25 = vld [vmem:[%s4402_s15 + $0x8] sm:$0xff]  ;;  %vm2469_vm6 = vcmask 654336  }
 0x2b1   : > { %3740 = vmatpush3.msk.msra.mxu0 %vm2081_vm5, %v2067_v5  ;;  %s4918_s23 = sld [smem:[#allocation16_spill]]  ;;  %v2160_v26 = vld [vmem:[%s4402_s15] sm:$0xff]  ;;  %v2250_v27 = vld [vmem:[%s4405_s5 + $0x10] sm:$0xf]  ;;  %v2249_v28 = vld [vmem:[%s4405_s5 + $0x8] sm:$0xff] }
 0x2b2   : > { %3741 = vmatprep.subr.mxu0 %v2066_v6  ;;  %v2248_v29 = vld [vmem:[%s4405_s5] sm:$0xff]  ;;  %s4920_s5 = sld [smem:[#allocation19_spill]] }
 0x2b3   : > { %v4581_v56 = vld [vmem:[#allocation2 + $0x8] sm:$0xff]  ;;  %3742 = vmatpush3.msra.mxu0 %v2066_v6  ;;  %s4921_s15 = sld [smem:[#allocation15_spill]] }
 0x2b4   : > { %v2025_v58 = vsel %vm2021_vm4, %v4581_v56, 0.0  ;;  %3743 = vmatprep.subr.mxu0 %v2065_v7 }
 0x2b5   : > { %v4579_v55 = vld [vmem:[#allocation2] sm:$0xff]  ;;  %3744 = vmatpush3.msra.mxu0 %v2065_v7  ;;  %s4916_s11 = scalar_lea.vmem %s4914_s3, %s4381_s1 }
 0x2b6   : > { %v2022_v57 = vsel %vm2021_vm4, %v4579_v55, 0.0  ;;  %3748 = vmatprep.subr.msk.mxu0 %vm2081_vm5, %v2162_v8  ;;  %v3455_v17 = vld [vmem:[%s4916_s11] ss:$0 sm:$0xff]  ;;  %s4917_s17 = scalar_lea.vmem %s4915_s30, %s4381_s1  ;;  %s4924_s11 = scalar_lea.vmem %s4236_s27, %s4381_s1 }
 0x2b7   : > { %2023 = vadd.xlane.f32.xlu0 %v2022_v57  ;;  %v3456_v19 = vld [vmem:[%s4917_s17] ss:$0 sm:$0xff]  ;;  %s4919_s2 = smov %s4918_s23  ;;  %v2491_v30 = vld [vmem:[%s4918_s23 + $0x48] sm:$0xff]  ;;  %s4925_s17 = scalar_lea.vmem %s4246_s14, %s4381_s1 }
 0x2b8   : > { %v2490_v31 = vld [vmem:[%s4919_s2 + $0x40] sm:$0xff]  ;;  %v2489_v32 = vld [vmem:[%s4919_s2 + $0x38] sm:$0xff]  ;;  %v2488_v33 = vld [vmem:[%s4919_s2 + $0x30] sm:$0xff]  ;;  %s4923_s30 = scalar_lea.vmem %s4920_s5, %s4381_s1 }
 0x2b9   : > { %v2487_v34 = vld [vmem:[%s4919_s2 + $0x28] sm:$0xff]  ;;  %v2486_v35 = vld [vmem:[%s4919_s2 + $0x20] sm:$0xff]  ;;  %v2485_v36 = vld [vmem:[%s4919_s2 + $0x18] sm:$0xff]  ;;  %s4922_s3 = smov %s4921_s15 }
 0x2ba   : > { %v2484_v37 = vld [vmem:[%s4919_s2 + $0x10] sm:$0xff]  ;;  %v2483_v38 = vld [vmem:[%s4919_s2 + $0x8] sm:$0xff]  ;;  %v2482_v39 = vld [vmem:[%s4919_s2] sm:$0xff] }
 0x2bb   : > { %2026 = vadd.xlane.f32.xlu0 %v2025_v58  ;;  %v4633_v41 = vld [vmem:[%s4923_s30] ss:$0 sm:$0xff]  ;;  %v2018_v46 = vld [vmem:[%s4921_s15 + $0x48] sm:$0xff]  ;;  %v2016_v54 = vld [vmem:[%s4922_s3 + $0x38] sm:$0xff] }
 0x2bc   : > { %v3461_v44 = vld [vmem:[%s4924_s11] ss:$0 sm:$0xff] }
 0x2bd   : > { %v2017_v49 = vld [vmem:[%s4922_s3 + $0x40] sm:$0xff] }
 0x2be   : > { %v3465_v52 = vld [vmem:[%s4925_s17] ss:$0 sm:$0xff] }
 0x2bf   : > { %v2013_v5 = vld [vmem:[%s4922_s3 + $0x20] sm:$0xff] }
 0x340   : > { %v2024_v59 = vpop.xlane.xlu0 %2023 }
 0x341   : > { %v2029_v60 = vmul.f32 0.05, %v2024_v59 }
 0x343   : > { %v2031_v61 = vsub.f32 %v4579_v55, %v2029_v60 }
 0x344   : > { %v2027_v62 = vpop.xlane.xlu0 %2026 }
 0x345   : > { %v2030_v63 = vmul.f32 0.05, %v2027_v62  ;;  %v2033_v0 = vmul.f32 %v2031_v61, %v2031_v61 }
 0x347   : > { %v2032_v1 = vsub.f32 %v4581_v56, %v2030_v63  ;;  %v2035_v2 = vsel %vm2021_vm4, %v2033_v0, 0.0  ;;  %v2012_v0 = vld [vmem:[%s4922_s3 + $0x18] sm:$0xff] }
 0x348   : > { %2036 = vadd.xlane.f32.xlu1 %v2035_v2 }
 0x349   : > { %v2034_v3 = vmul.f32 %v2032_v1, %v2032_v1 }
 0x34b   : > { %v2038_v4 = vsel %vm2021_vm4, %v2034_v3, 0.0 }
 0x34c   : > { %2039 = vadd.xlane.f32.xlu1 %v2038_v4  ;;  %v2015_v4 = vld [vmem:[%s4922_s3 + $0x30] sm:$0xff] }
 0x3d1   : > { %v2037_v9 = vpop.xlane.xlu1 %2036 }
 0x3d2   : > { %v2041_v11 = vmul.f32 0.05, %v2037_v9  ;;  %v2009_v9 = vld [vmem:[%s4922_s3] sm:$0xff] }
 0x3d4   : > { %v2043_v12 = vadd.f32 1e-05, %v2041_v11 }
 0x3d5   : > { %v2040_v13 = vpop.xlane.xlu1 %2039 }
 0x3d6   : > { %3994 = vrsqrt.f32 %v2043_v12  ;;  %v2042_v14 = vmul.f32 0.05, %v2040_v13 }
 0x3d8   : > { %v2044_v15 = vadd.f32 1e-05, %v2042_v14 }
 0x3da   : > { %3996 = vrsqrt.f32 %v2044_v15 }
 0x3e3   : > { %v3995_v16 = vpop.eup %3994 }
 0x3e4   : > { %v2047_v18 = vmul.f32 %v3995_v16, %v2031_v61  ;;  %v2014_v61 = vld [vmem:[%s4922_s3 + $0x28] sm:$0xff] }
 0x3e6   : > { %v2055_v20 = vmul.f32 %v3455_v17, %v2047_v18 }
 0x3e7   : > { %v3997_v21 = vpop.eup %3996 }
 0x3e8   : > { %v2048_v22 = vmul.f32 %v3997_v21, %v2032_v1  ;;  %v2063_v23 = vadd.f32 %v3456_v19, %v2055_v20  ;;  %v2010_v1 = vld [vmem:[%s4922_s3 + $0x8] sm:$0xff] }
 0x3ea   : > { %v2056_v24 = vmul.f32 %v3455_v17, %v2048_v22  ;;  %3745 = vmatprep.mubr.msk.f32.mxu0 %vm2021_vm4, %v2063_v23 }
 0x3ec   : > { %v2064_v10 = vadd.f32 %v3456_v19, %v2056_v24 }
 0x3ee   : > { %3746 = vmatmul.mubr.msk.f32.vlgmr.msra.gmra.mxu0 %vm2021_vm4, %v2064_v10 }
 0x3ef   : > { %3749 = vmatpush3.msk.msra.mxu0 %vm2081_vm5, %v2162_v8  ;;  %3754 = vmatprep.mubr.msk.f32.mxu0 %vm2021_vm4, %v2063_v23  ;;  %v2011_v8 = vld [vmem:[%s4922_s3 + $0x10] sm:$0xff] }
 0x3f0   : > { %3750 = vmatprep.subr.mxu0 %v2161_v25 }
 0x3f1   : > { %3751 = vmatpush3.msra.mxu0 %v2161_v25 }
 0x3f2   : > { %3752 = vmatprep.subr.mxu0 %v2160_v26 }
 0x3f3   : > { %3753 = vmatpush3.msra.mxu0 %v2160_v26 }
 0x3f4   : > { %3755 = vmatmul.mubr.msk.f32.vlgmr.msra.gmra.mxu0 %vm2021_vm4, %v2064_v10  ;;  %3757 = vmatprep.subr.msk.mxu0 %vm2081_vm5, %v2250_v27 }
 0x3f5   : > { %3758 = vmatpush3.msk.msra.mxu0 %vm2081_vm5, %v2250_v27  ;;  %3763 = vmatprep.mubr.msk.f32.mxu0 %vm2021_vm4, %v2063_v23 }
 0x3f6   : > { %3759 = vmatprep.subr.mxu0 %v2249_v28 }
 0x3f7   : > { %3760 = vmatpush3.msra.mxu0 %v2249_v28 }
 0x3f8   : > { %3761 = vmatprep.subr.mxu0 %v2248_v29 }
 0x3f9   : > { %3762 = vmatpush3.msra.mxu0 %v2248_v29 }
 0x3fa   : > { %3764 = vmatmul.mubr.msk.f32.vlgmr.msra.gmra.mxu0 %vm2021_vm4, %v2064_v10  ;;  %3789 = vmatprep.subr.mxu0 %v2491_v30 }
 0x3fb   : > { %3790 = vmatpush3.msra.mxu0 %v2491_v30 }
 0x3fc   : > { %3791 = vmatprep.subr.mxu0 %v2490_v31 }
 0x3fd   : > { %3792 = vmatpush3.msra.mxu0 %v2490_v31 }
 0x3fe   : > { %3793 = vmatprep.subr.mxu0 %v2489_v32 }
 0x3ff   : > { %3794 = vmatpush3.msra.mxu0 %v2489_v32 }
 0x400   : > { %3795 = vmatprep.subr.mxu0 %v2488_v33 }
 0x401   : > { %3796 = vmatpush3.msra.mxu0 %v2488_v33 }
 0x402   : > { %3797 = vmatprep.subr.mxu0 %v2487_v34 }
 0x403   : > { %3798 = vmatpush3.msra.mxu0 %v2487_v34 }
 0x404   : > { %3799 = vmatprep.subr.mxu0 %v2486_v35 }
 0x405   : > { %3800 = vmatpush3.msra.mxu0 %v2486_v35 }
 0x406   : > { %3801 = vmatprep.subr.mxu0 %v2485_v36 }
 0x407   : > { %3802 = vmatpush3.msra.mxu0 %v2485_v36 }
 0x408   : > { %3803 = vmatprep.subr.mxu0 %v2484_v37 }
 0x409   : > { %3804 = vmatpush3.msra.mxu0 %v2484_v37  ;;  %v2660_v37 = vld [vmem:[%s4408_s22 + $0x10] sm:$0xf] }
 0x40a   : > { %3805 = vmatprep.subr.mxu0 %v2483_v38 }
 0x40b   : > { %3806 = vmatpush3.msra.mxu0 %v2483_v38 }
 0x40c   : > { %3807 = vmatprep.subr.mxu0 %v2482_v39 }
 0x40d   : > { %3808 = vmatpush3.msra.mxu0 %v2482_v39 }
 0x4ae   : > { %v4628_v40 = vpop.f32.mrf.mxu0 }
 0x4af   : > { %v2157_v23 = vadd.f32 %v4628_v40, %v4633_v41 }
 0x4b0   : > { %v2151_v42 = vpop.f32.mrf.mxu0 }
 0x4b1   : > { %v2152_v43 = vadd.f32 %v4633_v41, %v2151_v42 }
 0x4b3   : > { %3786 = vmatprep.mubr.msk.f32.mxu1 %vm2021_vm4, %v2152_v43 }
 0x4b4   : > { %v3756_v45 = vpop.f32.mrf.mxu0 }
 0x4b5   : > { %v2245_v47 = vadd.f32 %v3756_v45, %v3461_v44  ;;  %v2658_v45 = vld [vmem:[%s4408_s22] sm:$0xff] }
 0x4b6   : > { %v2239_v48 = vpop.f32.mrf.mxu0 }
 0x4b7   : > { %v2240_v50 = vadd.f32 %v3461_v44, %v2239_v48  ;;  %v2345_v51 = vmul.f32 %v2245_v47, %v2018_v46  ;;  %v2343_v60 = vmul.f32 %v2245_v47, %v2016_v54  ;;  %v2341_v17 = vmul.f32 %v2245_v47, %v2014_v61  ;;  %v2659_v44 = vld [vmem:[%s4408_s22 + $0x8] sm:$0xff]  ;;  %s4926_s22 = scalar_lea.vmem %s4261_s29, %s4381_s1 }
 0x4b8   : > { %v2339_v19 = vmul.f32 %v2245_v47, %v2012_v0  ;;  %v2337_v21 = vmul.f32 %v2245_v47, %v2010_v1 }
 0x4b9   : > { %3766 = vmatprep.subr.msk.mxu1 %vm2021_vm4, %v2345_v51  ;;  %v2344_v53 = vmul.f32 %v2240_v50, %v2017_v49  ;;  %v2342_v16 = vmul.f32 %v2240_v50, %v2015_v4  ;;  %v2340_v18 = vmul.f32 %v2240_v50, %v2013_v5  ;;  %v2338_v20 = vmul.f32 %v2240_v50, %v2011_v8 }
 0x4ba   : > { %v3765_v57 = vpop.f32.mrf.mxu0  ;;  %3767 = vmatpush3.xpose.msk.msra.mxu1 %vm2021_vm4, %v2345_v51  ;;  %v2336_v22 = vmul.f32 %v2240_v50, %v2009_v9 }
 0x4bb   : > { %v2333_v58 = vadd.f32 %v3765_v57, %v3465_v52  ;;  %3768 = vmatprep.subr.msk.mxu1 %vm2021_vm4, %v2344_v53 }
 0x4bc   : > { %v2327_v59 = vpop.f32.mrf.mxu0 }
 0x4bd   : > { %v2328_v62 = vadd.f32 %v3465_v52, %v2327_v59  ;;  %v4650_v63 = vmul.f32 %v2333_v58, %v2018_v46  ;;  %v4654_v2 = vmul.f32 %v2333_v58, %v2016_v54  ;;  %v4656_v3 = vmul.f32 %v2333_v58, %v2014_v61 }
 0x4be   : > { %3769 = vmatpush3.xpose.msk.msra.mxu1 %vm2021_vm4, %v2344_v53  ;;  %v4661_v6 = vmul.f32 %v2333_v58, %v2012_v0  ;;  %v4663_v7 = vmul.f32 %v2333_v58, %v2010_v1 }
 0x4bf   : > { %3770 = vmatprep.subr.msk.mxu1 %vm2021_vm4, %v2343_v60  ;;  %3812 = vmatprep.subr.mxu0 %v4650_v63  ;;  %v2354_v11 = vmul.f32 %v2328_v62, %v2017_v49  ;;  %v2352_v12 = vmul.f32 %v2328_v62, %v2015_v4  ;;  %v2350_v13 = vmul.f32 %v2328_v62, %v2013_v5  ;;  %v3488_v49 = vld [vmem:[%s1158_s0] ss:$0 sm:$0xff]  ;;  %v2801_v4 = vld [vmem:[%s4417_s24 + $0x8] sm:$0xff] }
 0x4c0   : > { %v2348_v14 = vmul.f32 %v2328_v62, %v2011_v8  ;;  %v4669_v15 = vmul.f32 %v2328_v62, %v2009_v9  ;;  %v2800_v5 = vld [vmem:[%s4417_s24] sm:$0xff] }
 0x4c2   : > { %3771 = vmatpush3.xpose.msk.msra.mxu1 %vm2021_vm4, %v2343_v60 }
 0x4c3   : > { %3772 = vmatprep.subr.msk.mxu1 %vm2021_vm4, %v2342_v16 }
 0x4c6   : > { %3773 = vmatpush3.xpose.msk.msra.mxu1 %vm2021_vm4, %v2342_v16 }
 0x4c7   : > { %3774 = vmatprep.subr.msk.mxu1 %vm2021_vm4, %v2341_v17 }
 0x4ca   : > { %3775 = vmatpush3.xpose.msk.msra.mxu1 %vm2021_vm4, %v2341_v17 }
 0x4cb   : > { %3776 = vmatprep.subr.msk.mxu1 %vm2021_vm4, %v2340_v18 }
 0x4ce   : > { %3777 = vmatpush3.xpose.msk.msra.mxu1 %vm2021_vm4, %v2340_v18 }
 0x4cf   : > { %3778 = vmatprep.subr.msk.mxu1 %vm2021_vm4, %v2339_v19 }
 0x4d2   : > { %3779 = vmatpush3.xpose.msk.msra.mxu1 %vm2021_vm4, %v2339_v19  ;;  %v3490_v19 = vld [vmem:[%s1164_s18] ss:$0 sm:$0xff] }
 0x4d3   : > { %3780 = vmatprep.subr.msk.mxu1 %vm2021_vm4, %v2338_v20 }
 0x4d6   : > { %3781 = vmatpush3.xpose.msk.msra.mxu1 %vm2021_vm4, %v2338_v20 }
 0x4d7   : > { %3782 = vmatprep.subr.msk.mxu1 %vm2021_vm4, %v2337_v21 }
 0x4da   : > { %3783 = vmatpush3.xpose.msk.msra.mxu1 %vm2021_vm4, %v2337_v21 }
 0x4db   : > { %3784 = vmatprep.subr.msk.mxu1 %vm2021_vm4, %v2336_v22 }
 0x4de   : > { %3785 = vmatpush3.xpose.msk.msra.mxu1 %vm2021_vm4, %v2336_v22 }
 0x4df   : > { %3835 = vmatprep.subr.msk.mxu1 %vm2081_vm5, %v2660_v37 }
 0x4e1   : > { %3787 = vmatmul.mubr.msk.f32.vlgmr.msra.gmra.mxu1 %vm2021_vm4, %v2157_v23  ;;  %v2957_v23 = vld [vmem:[%s4425_s12 + $0x48] sm:$0xff] }
 0x4e2   : > { %3836 = vmatpush3.msk.msra.mxu1 %vm2081_vm5, %v2660_v37 }
 0x4e3   : > { %3837 = vmatprep.subr.mxu1 %v2659_v44 }
 0x4e4   : > { %3838 = vmatpush3.msra.mxu1 %v2659_v44 }
 0x4e5   : > { %3839 = vmatprep.subr.mxu1 %v2658_v45 }
 0x4e6   : > { %3840 = vmatpush3.msra.mxu1 %v2658_v45 }
 0x4e7   : > { %3853 = vmatprep.subr.mxu1 %v2957_v23 }
 0x5a1   : > { %v3788_v24 = vpop.f32.mrf.mxu1 }
 0x5a2   : > { %v2468_v10 = vmul.f32 0.2236068, %v3788_v24  ;;  %v2956_v24 = vld [vmem:[%s4425_s12 + $0x40] sm:$0xff] }
 0x5a3   : > { %v2458_v25 = vpop.f32.mrf.mxu1 }
 0x5a4   : > { %v2467_v26 = vmul.f32 0.2236068, %v2458_v25  ;;  %v2473_v27 = vsel %vm2469_vm6, %v2468_v10, -inf  ;;  %v2954_v25 = vld [vmem:[%s4425_s12 + $0x30] sm:$0xff] }
 0x5a5   : > { %2474 = vmax.xlane.f32.xlu1 %v2473_v27  ;;  %v2952_v27 = vld [vmem:[%s4425_s12 + $0x20] sm:$0xff] }
 0x5a6   : > { %v2470_v28 = vsel %vm2469_vm6, %v2467_v26, -inf }
 0x5a7   : > { %2471 = vmax.xlane.f32.xlu0 %v2470_v28  ;;  %v2951_v28 = vld [vmem:[%s4425_s12 + $0x18] sm:$0xff] }
 0x62e   : > { %v2475_v29 = vpop.xlane.xlu1 %2474 }
 0x62f   : > { %v2477_v30 = vsub.f32 %v2468_v10, %v2475_v29  ;;  %v2955_v10 = vld [vmem:[%s4425_s12 + $0x38] sm:$0xff]  ;;  %v2950_v29 = vld [vmem:[%s4425_s12 + $0x10] sm:$0xff] }
 0x630   : > { %v2472_v31 = vpop.xlane.xlu0 %2471 }
 0x631   : > { %v2476_v32 = vsub.f32 %v2467_v26, %v2472_v31  ;;  %v2480_v33 = vmul.f32 1.442695, %v2477_v30  ;;  %v2953_v26 = vld [vmem:[%s4425_s12 + $0x28] sm:$0xff]  ;;  %v2948_v31 = vld [vmem:[%s4425_s12] sm:$0xff] }
 0x632   : > { %v2949_v30 = vld [vmem:[%s4425_s12 + $0x8] sm:$0xff]  ;;  %s4928_s12 = sld [smem:[#allocation30_spill]] }
 0x633   : > { %v2478_v34 = vmul.f32 1.442695, %v2476_v32  ;;  %v3491_v32 = vld [vmem:[%s1172_s7] ss:$0 sm:$0xff] }
 0x635   : > { %3998 = vpow2.f32 %v2478_v34 }
 0x636   : > { %4000 = vpow2.f32 %v2480_v33 }
 0x638   : > { %p3498_p1 = scmp.ne.s32.totalorder %s4928_s12, 1 }
 0x639   : > { %s4929_s7 = sld [smem:[#allocation24_spill]] (!%p3498_p1) }
 0x63a   : > { %s4931_s18 = sld [smem:[#allocation25_spill]] (!%p3498_p1) }
 0x63f   : > { %s4930_s0 = smov (!%p3498_p1), %s4929_s7 }
 0x642   : > { %v3999_v35 = vpop.eup %3998 }
 0x643   : > { %v4001_v36 = vpop.eup %4000  ;;  %3809 = vmatprep.mubr.msk.f32.mxu0 %vm2469_vm6, %v3999_v35 }
 0x644   : > { %3810 = vmatmul.mubr.msk.f32.vlgmr.msra.gmra.mxu0 %vm2469_vm6, %v4001_v36 }
 0x645   : > { %3813 = vmatpush3.msra.mxu0 %v4650_v63 }
 0x646   : > { %3814 = vmatprep.subr.mxu0 %v2354_v11 }
 0x647   : > { %3815 = vmatpush3.msra.mxu0 %v2354_v11 }
 0x648   : > { %3816 = vmatprep.subr.mxu0 %v4654_v2 }
 0x649   : > { %3817 = vmatpush3.msra.mxu0 %v4654_v2 }
 0x64a   : > { %3818 = vmatprep.subr.mxu0 %v2352_v12 }
 0x64b   : > { %3819 = vmatpush3.msra.mxu0 %v2352_v12 }
 0x64c   : > { %3820 = vmatprep.subr.mxu0 %v4656_v3 }
 0x64d   : > { %3821 = vmatpush3.msra.mxu0 %v4656_v3  ;;  %v2802_v3 = vld [vmem:[%s4417_s24 + $0x10] sm:$0xf] }
 0x64e   : > { %3822 = vmatprep.subr.mxu0 %v2350_v13 }
 0x64f   : > { %3823 = vmatpush3.msra.mxu0 %v2350_v13 }
 0x650   : > { %3824 = vmatprep.subr.mxu0 %v4661_v6 }
 0x651   : > { %3825 = vmatpush3.msra.mxu0 %v4661_v6 }
 0x652   : > { %3826 = vmatprep.subr.mxu0 %v2348_v14 }
 0x653   : > { %3827 = vmatpush3.msra.mxu0 %v2348_v14  ;;  %v3489_v14 = vld [vmem:[%s4926_s22] ss:$0 sm:$0xff] }
 0x654   : > { %3828 = vmatprep.subr.mxu0 %v4663_v7 }
 0x655   : > { %3829 = vmatpush3.msra.mxu0 %v4663_v7 }
 0x656   : > { %3830 = vmatprep.subr.mxu0 %v4669_v15 }
 0x657   : > { %3831 = vmatpush3.msra.mxu0 %v4669_v15 }
 0x658   : > { %3844 = vmatprep.subr.msk.mxu0 %vm2081_vm5, %v2802_v3 }
 0x704   : > { %v3811_v38 = vpop.f32.mrf.mxu0 }
 0x705   : > { %4002 = vrcp.f32 %v3811_v38 }
 0x706   : > { %v2564_v39 = vpop.f32.mrf.mxu0 }
 0x707   : > { %4004 = vrcp.f32 %v2564_v39 }
 0x712   : > { %v4003_v40 = vpop.eup %4002 }
 0x713   : > { %v2576_v43 = vmul.f32 %v4003_v40, %v4001_v36 }
 0x714   : > { %v4005_v41 = vpop.eup %4004 }
 0x715   : > { %v2575_v42 = vmul.f32 %v4005_v41, %v3999_v35 }
 0x717   : > { %3832 = vmatprep.mubr.msk.f32.mxu0 %vm2469_vm6, %v2575_v42 }
 0x718   : > { %3833 = vmatmul.mubr.msk.f32.vlgmr.msra.gmra.mxu0 %vm2469_vm6, %v2576_v43 }
 0x719   : > { %3845 = vmatpush3.msk.msra.mxu0 %vm2081_vm5, %v2802_v3 }
 0x71a   : > { %3846 = vmatprep.subr.mxu0 %v2801_v4 }
 0x71b   : > { %3847 = vmatpush3.msra.mxu0 %v2801_v4 }
 0x71c   : > { %3848 = vmatprep.subr.mxu0 %v2800_v5 }
 0x71d   : > { %3849 = vmatpush3.msra.mxu0 %v2800_v5 }
 0x7d8   : > { %v3834_v46 = vpop.f32.mrf.mxu0 }
 0x7da   : > { %v2649_v47 = vpop.f32.mrf.mxu0 }
 0x7db   : > { %3841 = vmatprep.mubr.msk.f32.mxu1 %vm2021_vm4, %v2649_v47 }
 0x7dc   : > { %3842 = vmatmul.mubr.msk.f32.vlgmr.msra.gmra.mxu1 %vm2021_vm4, %v3834_v46 }
 0x7dd   : > { %3854 = vmatpush3.msra.mxu1 %v2957_v23 }
 0x7de   : > { %3855 = vmatprep.subr.mxu1 %v2956_v24 }
 0x7df   : > { %3856 = vmatpush3.msra.mxu1 %v2956_v24 }
 0x7e0   : > { %3857 = vmatprep.subr.mxu1 %v2955_v10 }
 0x7e1   : > { %3858 = vmatpush3.msra.mxu1 %v2955_v10 }
 0x7e2   : > { %3859 = vmatprep.subr.mxu1 %v2954_v25 }
 0x7e3   : > { %3860 = vmatpush3.msra.mxu1 %v2954_v25 }
 0x7e4   : > { %3861 = vmatprep.subr.mxu1 %v2953_v26 }
 0x7e5   : > { %3862 = vmatpush3.msra.mxu1 %v2953_v26 }
 0x7e6   : > { %3863 = vmatprep.subr.mxu1 %v2952_v27 }
 0x7e7   : > { %3864 = vmatpush3.msra.mxu1 %v2952_v27  ;;  %v3497_v27 = vld [vmem:[%s1180_s10] ss:$0 sm:$0xff] }
 0x7e8   : > { %3865 = vmatprep.subr.mxu1 %v2951_v28 }
 0x7e9   : > { %3866 = vmatpush3.msra.mxu1 %v2951_v28 }
 0x7ea   : > { %3867 = vmatprep.subr.mxu1 %v2950_v29 }
 0x7eb   : > { %3868 = vmatpush3.msra.mxu1 %v2950_v29 }
 0x7ec   : > { %3869 = vmatprep.subr.mxu1 %v2949_v30 }
 0x7ed   : > { %3870 = vmatpush3.msra.mxu1 %v2949_v30 }
 0x7ee   : > { %3871 = vmatprep.subr.mxu1 %v2948_v31 }
 0x7ef   : > { %3872 = vmatpush3.msra.mxu1 %v2948_v31 }
 0x89c   : > { %v3843_v48 = vpop.f32.mrf.mxu1 }
 0x89d   : > { %v2746_v50 = vadd.f32 %v3843_v48, %v4581_v56 }
 0x89e   : > { %v2736_v51 = vpop.f32.mrf.mxu1 }
 0x89f   : > { %v4717_v52 = vadd.f32 %v3488_v49, %v2746_v50  ;;  %v2745_v53 = vadd.f32 %v2736_v51, %v4579_v55 }
 0x8a1   : > { %v4720_v54 = vadd.f32 %v3488_v49, %v2745_v53  ;;  %v2761_v57 = vsel %vm2021_vm4, %v4717_v52, 0.0 }
 0x8a2   : > { %2762 = vadd.xlane.f32.xlu1 %v2761_v57 }
 0x8a3   : > { %v2758_v58 = vsel %vm2021_vm4, %v4720_v54, 0.0 }
 0x8a4   : > { %2759 = vadd.xlane.f32.xlu0 %v2758_v58 }
 0x92b   : > { %v2763_v59 = vpop.xlane.xlu1 %2762 }
 0x92c   : > { %v2765_v56 = vmul.f32 0.05, %v2763_v59 }
 0x92d   : > { %v2760_v60 = vpop.xlane.xlu0 %2759 }
 0x92e   : > { %v2767_v61 = vsub.f32 %v4717_v52, %v2765_v56  ;;  %v2764_v62 = vmul.f32 0.05, %v2760_v60 }
 0x930   : > { %v2766_v55 = vsub.f32 %v4720_v54, %v2764_v62  ;;  %v2769_v63 = vmul.f32 %v2767_v61, %v2767_v61 }
 0x932   : > { %v2773_v0 = vsel %vm2021_vm4, %v2769_v63, 0.0  ;;  %v2768_v1 = vmul.f32 %v2766_v55, %v2766_v55 }
 0x933   : > { %2774 = vadd.xlane.f32.xlu1 %v2773_v0 }
 0x934   : > { %v2770_v2 = vsel %vm2021_vm4, %v2768_v1, 0.0 }
 0x935   : > { %2771 = vadd.xlane.f32.xlu0 %v2770_v2 }
 0x9bc   : > { %v2775_v6 = vpop.xlane.xlu1 %2774 }
 0x9bd   : > { %v2777_v7 = vmul.f32 0.05, %v2775_v6 }
 0x9be   : > { %v2772_v8 = vpop.xlane.xlu0 %2771 }
 0x9bf   : > { %v2779_v9 = vadd.f32 1e-05, %v2777_v7  ;;  %v2776_v11 = vmul.f32 0.05, %v2772_v8 }
 0x9c1   : > { %4006 = vrsqrt.f32 %v2779_v9  ;;  %v2778_v12 = vadd.f32 1e-05, %v2776_v11 }
 0x9c3   : > { %4008 = vrsqrt.f32 %v2778_v12 }
 0x9ce   : > { %v4007_v13 = vpop.eup %4006 }
 0x9cf   : > { %v2783_v15 = vmul.f32 %v4007_v13, %v2767_v61 }
 0x9d0   : > { %v4009_v16 = vpop.eup %4008 }
 0x9d1   : > { %v2782_v17 = vmul.f32 %v4009_v16, %v2766_v55  ;;  %v2791_v18 = vmul.f32 %v3489_v14, %v2783_v15 }
 0x9d3   : > { %v2790_v20 = vmul.f32 %v3489_v14, %v2782_v17  ;;  %v2799_v22 = vadd.f32 %v3490_v19, %v2791_v18  ;;  %v4144_v14 = vmov 1.0  }
 0x9d5   : > { %v2798_v21 = vadd.f32 %v3490_v19, %v2790_v20 }
 0x9d7   : > { %3850 = vmatprep.mubr.msk.f32.mxu0 %vm2021_vm4, %v2798_v21 }
 0x9d8   : > { %3851 = vmatmul.mubr.msk.f32.vlgmr.msra.gmra.mxu0 %vm2021_vm4, %v2799_v22 }
 0xa98   : > { %v3852_v33 = vpop.f32.mrf.mxu0 }
 0xa99   : > { %v2891_v34 = vadd.f32 %v3852_v33, %v3491_v32 }
 0xa9a   : > { %v2885_v35 = vpop.f32.mrf.mxu0 }
 0xa9b   : > { %v2897_v36 = vmul.f32 0.70710677, %v2891_v34  ;;  %v2886_v37 = vadd.f32 %v3491_v32, %v2885_v35  ;;  %v2895_v24 = vmul.f32 0.5, %v2891_v34 }
 0xa9d   : > { %v2903_v38 = vand.u32 2147483647, %v2897_v36  ;;  %v2896_v39 = vmul.f32 0.70710677, %v2886_v37  ;;  %vm2899_vm7 = vcmp.lt.f32.partialorder %v2897_v36, 0.0  ;;  %v2894_v22 = vmul.f32 0.5, %v2886_v37 }
 0xa9e   : > { %v2901_v15 = vsel %vm2899_vm7, -1.0, %v4144_v14 }
 0xa9f   : > { %v2905_v40 = vmul.f32 0.3275911, %v2903_v38  ;;  %v2902_v41 = vand.u32 2147483647, %v2896_v39  ;;  %v2931_v45 = vsub.f32 0.0, %v2903_v38  ;;  %vm2898_vm8 = vcmp.lt.f32.partialorder %v2896_v39, 0.0 }
 0xaa0   : > { %v2900_v19 = vsel %vm2898_vm8, -1.0, %v4144_v14 }
 0xaa1   : > { %v2907_v42 = vadd.f32 1.0, %v2905_v40  ;;  %v2904_v43 = vmul.f32 0.3275911, %v2902_v41  ;;  %v2930_v46 = vsub.f32 0.0, %v2902_v41  ;;  %v2933_v47 = vmul.f32 %v2931_v45, %v2903_v38 }
 0xaa3   : > { %4010 = vrcp.f32 %v2907_v42  ;;  %v2906_v44 = vadd.f32 1.0, %v2904_v43  ;;  %v2932_v49 = vmul.f32 %v2930_v46, %v2902_v41  ;;  %v2936_v51 = vmul.f32 1.442695, %v2933_v47 }
 0xaa5   : > { %4012 = vrcp.f32 %v2906_v44  ;;  %v2934_v59 = vmul.f32 1.442695, %v2932_v49 }
 0xaa6   : > { %4014 = vpow2.f32 %v2936_v51 }
 0xaa7   : > { %4016 = vpow2.f32 %v2934_v59 }
 0xab0   : > { %v4011_v48 = vpop.eup %4010 }
 0xab1   : > { %v2913_v50 = vmul.f32 1.0614054, %v4011_v48 }
 0xab2   : > { %v4013_v53 = vpop.eup %4012 }
 0xab3   : > { %v2915_v57 = vadd.f32 -1.4531521, %v2913_v50  ;;  %v2912_v58 = vmul.f32 1.0614054, %v4013_v53  ;;  %v4015_v7 = vpop.eup %4014 }
 0xab4   : > { %v4017_v12 = vpop.eup %4016 }
 0xab5   : > { %v2917_v56 = vmul.f32 %v4011_v48, %v2915_v57  ;;  %v2914_v60 = vadd.f32 -1.4531521, %v2912_v58 }
 0xab7   : > { %v2919_v61 = vadd.f32 1.4214138, %v2917_v56  ;;  %v2916_v62 = vmul.f32 %v4013_v53, %v2914_v60 }
 0xab9   : > { %v2921_v55 = vmul.f32 %v4011_v48, %v2919_v61  ;;  %v2918_v63 = vadd.f32 1.4214138, %v2916_v62 }
 0xabb   : > { %v2923_v0 = vadd.f32 -0.28449672, %v2921_v55  ;;  %v2920_v1 = vmul.f32 %v4013_v53, %v2918_v63 }
 0xabd   : > { %v2925_v2 = vmul.f32 %v4011_v48, %v2923_v0  ;;  %v2922_v3 = vadd.f32 -0.28449672, %v2920_v1 }
 0xabf   : > { %v2927_v4 = vadd.f32 0.2548296, %v2925_v2  ;;  %v2924_v5 = vmul.f32 %v4013_v53, %v2922_v3 }
 0xac1   : > { %v2929_v6 = vmul.f32 %v4011_v48, %v2927_v4  ;;  %v2926_v8 = vadd.f32 0.2548296, %v2924_v5 }
 0xac3   : > { %v2939_v9 = vmul.f32 %v4015_v7, %v2929_v6  ;;  %v2928_v11 = vmul.f32 %v4013_v53, %v2926_v8 }
 0xac5   : > { %v2941_v13 = vsub.f32 1.0, %v2939_v9  ;;  %v2938_v16 = vmul.f32 %v4017_v12, %v2928_v11 }
 0xac7   : > { %v2943_v17 = vmul.f32 %v2941_v13, %v2901_v15  ;;  %v2940_v18 = vsub.f32 1.0, %v2938_v16 }
 0xac9   : > { %v2942_v20 = vmul.f32 %v2940_v18, %v2900_v19  ;;  %v2945_v21 = vadd.f32 1.0, %v2943_v17 }
 0xacb   : > { %v2944_v23 = vadd.f32 1.0, %v2942_v20  ;;  %v2947_v25 = vmul.f32 %v2945_v21, %v2895_v24 }
 0xacd   : > { %v2946_v10 = vmul.f32 %v2944_v23, %v2894_v22 }
 0xacf   : > { %3873 = vmatprep.mubr.msk.f32.mxu1 %vm2469_vm6, %v2946_v10 }
 0xad0   : > { %3874 = vmatmul.mubr.msk.f32.vlgmr.msra.gmra.mxu1 %vm2469_vm6, %v2947_v25 }
 0xb90   : > { %v3875_v26 = vpop.f32.mrf.mxu1 }
 0xb91   : > { %v3040_v28 = vadd.f32 %v3875_v26, %v4717_v52 }
 0xb92   : > { %v3030_v29 = vpop.f32.mrf.mxu1 }
 0xb93   : > { %v3049_v30 = vadd.f32 %v3497_v27, %v3040_v28  ;;  %v3039_v31 = vadd.f32 %v3030_v29, %v4720_v54  ;;  %3055 = sbr.rel (%p3498_p1) target bundleno = 3173 (0xc65), region = 144 }
 0xb95   : > { %3051 = vst.msk [vmem:[#allocation2 + $0x8] sm:$0xff] %vm2021_vm4, %v3049_v30  ;;  %v3048_v32 = vadd.f32 %v3497_v27, %v3039_v31 }
 0xb97   : > { %3050 = vst.msk [vmem:[#allocation2] sm:$0xff] %vm2021_vm4, %v3048_v32 }
 0xb98   : > { %v3058_v33 = vld [vmem:[%s4929_s7 + $0x10] sm:$0xf]  ;;  %v3057_v34 = vld [vmem:[%s4930_s0 + $0x8] sm:$0xff]  ;;  %3882 = vmatprep.mubr.msk.f32.mxu0 %vm2021_vm4, %v3048_v32  ;;  %v3056_v52 = vld [vmem:[%s4930_s0] sm:$0xff] }
 0xb99   : > { %3876 = vmatprep.subr.msk.mxu0 %vm2081_vm5, %v3058_v33  ;;  %v3499_v54 = vld [vmem:[%s4931_s18] ss:$0 sm:$0xff] }
 0xb9a   : > { %3877 = vmatpush3.msk.msra.mxu0 %vm2081_vm5, %v3058_v33 }
 0xb9b   : > { %3878 = vmatprep.subr.mxu0 %v3057_v34 }
 0xb9c   : > { %3879 = vmatpush3.msra.mxu0 %v3057_v34 }
 0xb9d   : > { %3880 = vmatprep.subr.mxu0 %v3056_v52 }
 0xb9e   : > { %3881 = vmatpush3.msra.mxu0 %v3056_v52 }
 0xb9f   : > { %3883 = vmatmul.mubr.msk.f32.vlgmr.msra.gmra.mxu0 %vm2021_vm4, %v3049_v30 }
 0xc5f   : > { %v3884_v35 = vpop.f32.mrf.mxu0 }
 0xc60   : > { %v3147_v36 = vadd.f32 %v3884_v35, %v3499_v54 }
 0xc61   : > { %v3141_v37 = vpop.f32.mrf.mxu0 }
 0xc62   : > { %3151 = vst [vmem:[%s4427_s16 + $0x8] sm:$0xff] %v3147_v36  ;;  %v3142_v38 = vadd.f32 %v3499_v54, %v3141_v37 }
 0xc64   : > { %3150 = vst [vmem:[%s4427_s16] sm:$0xff] %v3142_v38 }
 0xc65 PF: > { %s4932_s10 = sld [smem:[#allocation31_spill]]  ;;  %s3166_s11 = sshll.u32 %s4427_s16, 4  ;;  %s4781_s11 = int_to_ptr.vmem [resolvable:$true] %s3166_s11 }
 0xc66   : > { %s4933_s1 = sld [smem:[#allocation26_spill]]  ;;  %s4018_s24 = scalar_lea.vmem %s4781_s11, 256 }
 0xc67   : > { %s4934_s23 = sld [smem:[#allocation28_spill]]  ;;  %p4019_p2 = scmp.ne.s32.totalorder %s4781_s11, %s4018_s24 }
 0xc68   : > { %s4145_s12 = smov [#allocation3]  }
 0xc69   : > { %p4020_p4 = pnand %p4019_p2, %p4352_p3  ;;  %s4022_s7 = sshll.u32 %s4145_s12, 4  ;;  %s4023_s7 = int_to_ptr.vmem [resolvable:$false] %s4022_s7 }
 0xc6a   : > { %s4024_s18 = scalar_lea.vmem %s4023_s7, 512  ;;  %p4025_p6 = scmp.lt.s32.totalorder %s4781_s11, %s4023_s7 }
 0xc6b   : > { %s3508_s15 = sshll.u32 %s4932_s10, 8  ;;  %p4021_p5 = pneg %p4020_p4 }
 0xc6c   : > { %s4778_s30 = scalar_lea.hbm %s4933_s1, %s3508_s15  ;;  %p4026_p7 = scmp.lt.s32.totalorder %s4024_s18, %s4018_s24 }
 0xc6d   : > { %s4936_s17 = sand.u32 1, %s4934_s23  }
 0xc6e   : > { %s4785_s22 = scalar_lea.sflag [#allocation4], %s4936_s17  ;;  %p4027_p8 = por %p4026_p7, %p4025_p6 }
 0xc70   : > { %p4028_p10 = pnand %p4027_p8, %p4021_p5 }
 0xc72   : > { %4031 = shalt.err (!%p4028_p10)
}
 0xc73   : > { %s4032_s16 = scalar_lea.hbm %s4778_s30, 256  ;;  %s4036_s10 = scalar_lea.hbm %s4933_s1, 512 }
 0xc74   : > { %p4033_p11 = scmp.ne.s32.totalorder %s4778_s30, %s4032_s16  ;;  %p4037_p0 = scmp.lt.s32.totalorder %s4778_s30, %s4933_s1 }
 0xc75   : > { %p4038_p1 = scmp.lt.s32.totalorder %s4036_s10, %s4032_s16 }
 0xc76   : > { %p4034_p12 = pnand %p4033_p11, %p4352_p3 }
 0xc77   : > { %p4039_p2 = por %p4038_p1, %p4037_p0 }
 0xc78   : > { %p4035_p13 = pneg %p4034_p12 }
 0xc7a   : > { %p4040_p4 = pnand %p4039_p2, %p4035_p13 }
 0xc7c   : > { %4043 = shalt.err (!%p4040_p4)
}
 0xc7d   : > { %s4146_s23 = smov 128   ;;  %s4147_s15 = smov 8  }
 0xc7e   : > { %3887 = dma.vmem_to_hbm [thread:$0]  (%p4352_p3), %s4781_s11, 256, %s4778_s30, %s4785_s22, %s4146_s23, %s4146_s23, %s4147_s15  }
 0xc7f PF: > { %s4937_s17 = sld [smem:[#allocation34_spill]] }
 0xc80   : > { %s4938_s24 = sld [smem:[#allocation27_spill]] }
 0xc85   : > { %p3893_p5 = scmp.ge.s32.totalorder %s4937_s17, 2 }
 0xc86   : > { %s3181_s7 = sand.u32 1, %s4938_s24  }
 0xc87   : > { %p3890_p6 = pnand %p3893_p5, %p4362_p9  ;;  %s3182_s18 = scalar_lea.sflag [#allocation4], %s3181_s7 }
 0xc89   : > { %p3891_p7 = pneg %p3890_p6 }
 0xc8b   : > { %4077 = dma.done.wait (%p3891_p7), %s3182_s18, 256  }
 0xc8c   : > { %4079 = vsyncadd (%p3891_p7), %s3182_s18, 4294967040  ;;  %s72_s23 = sadd.s32 1, %s4937_s17   ;;  %s4940_s7 = sld [smem:[#allocation28_spill]] }
 0xc8d   : > { %p69_p8 = scmp.ge.s32.totalorder %s72_s23, 6   ;;  %s4941_s10 = sld [smem:[#allocation29_spill]] }
 0xc8e   : > { %s4942_s11 = sld [smem:[#allocation39_spill]] }
 0xc8f   : > { %s4943_s15 = sld [smem:[#allocation32_spill]]  ;;  %71 = sbr.rel (!%p69_p8) target bundleno = 62 (0x3e), region = 259 }
 0xc90   : > { %s4944_s16 = sld [smem:[#allocation33_spill]] }
 0xc91   : > { %s4945_s18 = sld [smem:[#allocation35_spill]] }
 0xc92   : > { %s4946_s22 = sld [smem:[#allocation37_spill]] }
 0xc94   :  { %3187 = vsyncpa [#allocation4], 1 }
 0xc95   :  { %3189 = vsyncpa [#allocation4 + $0x1], 1 }

</bundles_post_ra>
